<compile_context>
chip_gen: v5e
topology: v5e:2x2
jax: 0.10.0
libtpu: 0.0.40
codegen_flags: <defaults>
</compile_context>

<pallas_src>
import numpy as np
import jax
import jax.numpy as jnp
from jax import lax
from jax.experimental import pallas as pl
from jax.experimental.pallas import tpu as pltpu

LN_EPS = 1e-5


def _sinusoid_table(num_patch: int, embed_dim: int) -> np.ndarray:
    """Exactly the PositionalEncoding.get_position_table construction."""
    pos = np.arange(num_patch)[:, None].astype(np.float64)          # (N, 1)
    i = np.arange(embed_dim)[None, :]                               # (1, E)
    angle = pos / np.power(10000.0, 2.0 * (i // 2) / embed_dim)     # (N, E)
    table = np.array(angle)
    table[:, 0::2] = np.sin(table[:, 0::2])
    table[:, 1::2] = np.cos(table[:, 1::2])
    return table.astype(np.float32)                                 # (N, E)


def _embeddings_kernel(x_ref, w_ref, p_ref, posb_ref, o_ref):
    # x_ref:    (C, tn)  f32  -- channel-major token slab of one batch element
    # w_ref:    (C, E)   bf16 -- 1x1-conv weight, (in, out)
    # p_ref:    (2, E)   f32  -- row 0 = conv bias, row 1 = LN gamma
    # posb_ref: (tn, E)  f32  -- positional-table tile with LN beta folded in
    # o_ref:    (tn, E)  out dtype
    # Convert x to the MXU compute dtype in-kernel (cheap VPU work hidden under DMA), then
    # contract the channel dim of the transposed LHS directly on the MXU (no data transpose),
    # accumulating in f32.
    x = x_ref[...].astype(w_ref.dtype)                               # f32 -> bf16
    y = lax.dot_general(
        x, w_ref[...],
        dimension_numbers=(((0,), (0,)), ((), ())),
        preferred_element_type=jnp.float32)                          # (tn, E) f32

    p = p_ref[...]                                                   # (2, E) f32
    y = y + p[0:1, :]                                                # conv bias

    # LayerNorm over embed dim (biased variance, eps inside rsqrt — PyTorch semantics), f32.
    mean = jnp.mean(y, axis=-1, keepdims=True)
    centered = y - mean
    var = jnp.mean(centered * centered, axis=-1, keepdims=True)
    y = centered * lax.rsqrt(var + LN_EPS)

    # gamma * y + (beta + pos_table)  (beta pre-folded into posb in prepare_embedding_params)
    y = y * p[1:2, :] + posb_ref[...]

    # TODO(synk): Dropout(p=0.1) is identity in eval mode; training-mode dropout not modeled.
    o_ref[...] = y.astype(o_ref.dtype)


def _pick_row_tile(n: int) -> int:
    # Fixed 256-row tiles (v6e/v7x sweet spot); Pallas masks the partial last tile, so no
    # divisibility requirement on N.  Short sequences take the full extent (full-dim blocks
    # waive the (8,128) divisibility rule).
    return 256 if n >= 256 else n


def prepare_embedding_params(w_conv, b_conv, gamma, beta, pos_table,
                             compute_dtype=jnp.bfloat16):
    """One-time host-side prep (hoisted out of the forward path)."""
    E, C = w_conv.shape[0], w_conv.shape[1]
    w_t = w_conv.reshape(E, C).T.astype(compute_dtype)               # (C, E) bf16, tiny
    params = jnp.concatenate(
        [b_conv.reshape(1, E), gamma.reshape(1, E)], axis=0).astype(jnp.float32)   # (2, E)
    pos_beta = (pos_table + beta.reshape(1, E)).astype(jnp.float32)  # (N, E), beta folded in
    return w_t, params, pos_beta


def embeddings_forward(x_nchw, w_t, params, pos_beta, out_dtype=jnp.float32):
    """x_nchw: (B, C, H, W) float32.  Returns (B, H*W, E) in out_dtype."""
    B, C, H, W = x_nchw.shape
    N = H * W
    E = w_t.shape[1]
    tn = _pick_row_tile(N)
    n_tiles = pl.cdiv(N, tn)

    # No HBM transpose and no standalone cast pass: keep the natural channel-major f32
    # (B, C, N) layout (free reshape of NCHW); the bf16 convert happens inside the kernel.
    x_bcn = x_nchw.reshape(B, C, N)                                  # (B, C, N) f32

    # VMEM budget: double-buffered x / pos / out tiles + (double-buffered) weight & params.
    out_bpe = jnp.dtype(out_dtype).itemsize
    w_bpe = jnp.dtype(w_t.dtype).itemsize
    est = (2 * C * tn * 4            # x tile, f32
           + 2 * tn * E * 4          # pos tile, f32
           + 2 * tn * E * out_bpe    # out tile
           + 2 * C * E * w_bpe       # weight (resident, default-double-buffered)
           + 2 * 2 * E * 4)          # params
    vmem_limit = int(min(2 * est + (4 << 20), 48 << 20))

    out = pl.pallas_call(
        _embeddings_kernel,
        out_shape=jax.ShapeDtypeStruct((B, N, E), out_dtype),
        grid_spec=pltpu.PrefetchScalarGridSpec(
            num_scalar_prefetch=0,
            # Row tiles OUTER, batch INNER: pos/weight/params block indices are unchanged
            # across consecutive (inner) batch steps, so they are DMA'd once per row tile.
            grid=(n_tiles, B),
            in_specs=[
                pl.BlockSpec((pl.Squeezed(), C, tn), lambda n, b: (b, 0, n)),
                pl.BlockSpec((C, E), lambda n, b: (0, 0)),
                pl.BlockSpec((2, E), lambda n, b: (0, 0)),
                pl.BlockSpec((tn, E), lambda n, b: (n, 0)),
            ],
            out_specs=pl.BlockSpec((pl.Squeezed(), tn, E), lambda n, b: (b, n, 0)),
        ),
        compiler_params=pltpu.CompilerParams(
            dimension_semantics=("parallel", "parallel"),
            vmem_limit_bytes=vmem_limit),
    )(x_bcn, w_t, params, pos_beta)
    return out


if __name__ == "__main__":
    # Scaled-down config consistent with the module (real defaults: C=1024, E=512, N=690):
    #   img_size=(18, 16), patch_size=(1, 1) -> N = 288 patches, which exercises the
    #   masked-partial-last-tile path (one full 256-row tile + one partial tile), as the real
    #   N = 690 config does.  E=128 keeps output stores lane-dense.
    B, C, H, W = 2, 64, 18, 16
    E = 128
    N = H * W

    key = jax.random.PRNGKey(0)
    kx, kw, kb, kg, kbe = jax.random.split(key, 5)

    x = jax.random.normal(kx, (B, C, H, W), dtype=jnp.float32)
    # Conv2d weight shape (E, C, 1, 1); deterministic init.
    w_conv = jax.random.normal(kw, (E, C, 1, 1), dtype=jnp.float32) * 0.02
    b_conv = jax.random.normal(kb, (E,), dtype=jnp.float32) * 0.01
    gamma = jnp.ones((E,), dtype=jnp.float32) + 0.1 * jax.random.normal(kg, (E,), jnp.float32)
    beta = 0.1 * jax.random.normal(kbe, (E,), dtype=jnp.float32)
    pos_table = jnp.asarray(_sinusoid_table(N, E))

    # One-time parameter prep (not part of the per-call forward path).
    w_t, params, pos_beta = prepare_embedding_params(w_conv, b_conv, gamma, beta, pos_table)

    out = embeddings_forward(x, w_t, params, pos_beta)
    out = jax.block_until_ready(out)

    # Reference in plain JAX (same math; x/weight rounded to bf16 exactly as the kernel does).
    x_tok = jnp.transpose(x.reshape(B, C, N), (0, 2, 1))             # (B, N, C)
    xb = x_tok.astype(jnp.bfloat16).astype(jnp.float32)
    wb = w_conv.reshape(E, C).T.astype(jnp.bfloat16).astype(jnp.float32)
    ref = xb @ wb + b_conv
    mu = ref.mean(-1, keepdims=True)
    var = ((ref - mu) ** 2).mean(-1, keepdims=True)
    ref = (ref - mu) * lax.rsqrt(var + LN_EPS) * gamma + beta
    ref = ref + pos_table[None]

    assert out.shape == (B, N, E)
    err = float(jnp.max(jnp.abs(out - ref)))
    assert err < 2e-3, f"max abs err {err}"
    print("KERNEL_OK")
</pallas_src>

<mosaic_0001>
module attributes {stable_mosaic.version = 11 : i64} {
  func.func @_embeddings_kernel(%arg0: i32, %arg1: i32, %arg2: memref<1x64x256xf32, #tpu.memory_space<vmem>>, %arg3: memref<64x128xbf16, #tpu.memory_space<vmem>>, %arg4: memref<2x128xf32, #tpu.memory_space<vmem>>, %arg5: memref<256x128xf32, #tpu.memory_space<vmem>>, %arg6: memref<1x256x128xf32, #tpu.memory_space<vmem>>) attributes {dimension_semantics = [#tpu.dimension_semantics<parallel>, #tpu.dimension_semantics<parallel>], iteration_bounds = array<i64: 2, 2>, scalar_prefetch = 0 : i64, scratch_operands = 0 : i64, tpu.core_type = #tpu.core_type<tc>, window_params = [{transform_indices = @transform_0, window_bounds = array<i64: 1, 64, 256>}, {pipeline_mode = #tpu.pipeline_mode<synchronous>, transform_indices = @transform_1, window_bounds = array<i64: 64, 128>}, {pipeline_mode = #tpu.pipeline_mode<synchronous>, transform_indices = @transform_2, window_bounds = array<i64: 2, 128>}, {transform_indices = @transform_3, window_bounds = array<i64: 256, 128>}, {transform_indices = @transform_4, window_bounds = array<i64: 1, 256, 128>}]} {
    %c0 = arith.constant 0 : index
    %c0_0 = arith.constant 0 : index
    %c0_1 = arith.constant 0 : index
    %0 = vector.load %arg2[%c0, %c0_0, %c0_1] : memref<1x64x256xf32, #tpu.memory_space<vmem>>, vector<1x64x256xf32>
    %1 = vector.shape_cast %0 : vector<1x64x256xf32> to vector<64x256xf32>
    %2 = arith.truncf %1 : vector<64x256xf32> to vector<64x256xbf16>
    %c0_2 = arith.constant 0 : index
    %c0_3 = arith.constant 0 : index
    %3 = vector.load %arg3[%c0_2, %c0_3] : memref<64x128xbf16, #tpu.memory_space<vmem>>, vector<64x128xbf16>
    %cst = arith.constant dense<0.000000e+00> : vector<256x128xf32>
    %4 = tpu.matmul %2, %3, %cst {dimension_numbers = #tpu.dot_dimension_numbers<[0], [0], [1], [1], [0, 1, 1, 1], [], []>} : vector<64x256xbf16>, vector<64x128xbf16>, vector<256x128xf32> -> vector<256x128xf32>
    %c0_4 = arith.constant 0 : index
    %c0_5 = arith.constant 0 : index
    %5 = vector.load %arg4[%c0_4, %c0_5] : memref<2x128xf32, #tpu.memory_space<vmem>>, vector<2x128xf32>
    %6 = vector.extract_strided_slice %5 {offsets = [0, 0], sizes = [1, 128], strides = [1, 1]} : vector<2x128xf32> to vector<1x128xf32>
    %7 = vector.broadcast %6 : vector<1x128xf32> to vector<256x128xf32>
    %8 = arith.addf %4, %7 : vector<256x128xf32>
    %cst_6 = arith.constant dense<0.000000e+00> : vector<256xf32>
    %9 = vector.multi_reduction <add>, %8, %cst_6 [1] : vector<256x128xf32> to vector<256xf32>
    %10 = vector.shape_cast %9 : vector<256xf32> to vector<256x1xf32>
    %cst_7 = arith.constant 1.280000e+02 : f32
    %11 = vector.broadcast %cst_7 : f32 to vector<256x1xf32>
    %12 = arith.divf %10, %11 : vector<256x1xf32>
    %13 = vector.broadcast %12 : vector<256x1xf32> to vector<256x128xf32>
    %14 = arith.subf %8, %13 : vector<256x128xf32>
    %15 = arith.mulf %14, %14 : vector<256x128xf32>
    %cst_8 = arith.constant dense<0.000000e+00> : vector<256xf32>
    %16 = vector.multi_reduction <add>, %15, %cst_8 [1] : vector<256x128xf32> to vector<256xf32>
    %17 = vector.shape_cast %16 : vector<256xf32> to vector<256x1xf32>
    %cst_9 = arith.constant 1.280000e+02 : f32
    %18 = vector.broadcast %cst_9 : f32 to vector<256x1xf32>
    %19 = arith.divf %17, %18 : vector<256x1xf32>
    %cst_10 = arith.constant 9.99999974E-6 : f32
    %20 = vector.broadcast %cst_10 : f32 to vector<256x1xf32>
    %21 = arith.addf %19, %20 : vector<256x1xf32>
    %22 = math.rsqrt %21 : vector<256x1xf32>
    %23 = vector.broadcast %22 : vector<256x1xf32> to vector<256x128xf32>
    %24 = arith.mulf %14, %23 : vector<256x128xf32>
    %25 = vector.extract_strided_slice %5 {offsets = [1, 0], sizes = [1, 128], strides = [1, 1]} : vector<2x128xf32> to vector<1x128xf32>
    %26 = vector.broadcast %25 : vector<1x128xf32> to vector<256x128xf32>
    %27 = arith.mulf %24, %26 : vector<256x128xf32>
    %c0_11 = arith.constant 0 : index
    %c0_12 = arith.constant 0 : index
    %28 = vector.load %arg5[%c0_11, %c0_12] : memref<256x128xf32, #tpu.memory_space<vmem>>, vector<256x128xf32>
    %29 = arith.addf %27, %28 : vector<256x128xf32>
    %c0_13 = arith.constant 0 : index
    %c0_14 = arith.constant 0 : index
    %c0_15 = arith.constant 0 : index
    %30 = vector.load %arg6[%c0_13, %c0_14, %c0_15] : memref<1x256x128xf32, #tpu.memory_space<vmem>>, vector<1x256x128xf32>
    %31 = vector.shape_cast %30 : vector<1x256x128xf32> to vector<256x128xf32>
    %32 = vector.shape_cast %29 : vector<256x128xf32> to vector<1x256x128xf32>
    tpu.vector_store %arg6[%c0_13, %c0_14, %c0_15], %32 {strides = array<i32>} : memref<1x256x128xf32, #tpu.memory_space<vmem>>, vector<1x256x128xf32>,
    return
  }
  func.func @transform_0(%arg0: i32, %arg1: i32) -> (i32, i32, i32) {
    %c0_i32 = arith.constant 0 : i32
    %c0_i32_0 = arith.constant 0 : i32
    return %arg1, %c0_i32, %arg0 : i32, i32, i32
  }
  func.func @transform_1(%arg0: i32, %arg1: i32) -> (i32, i32) {
    %c0_i32 = arith.constant 0 : i32
    %c0_i32_0 = arith.constant 0 : i32
    %c0_i32_1 = arith.constant 0 : i32
    return %c0_i32, %c0_i32_0 : i32, i32
  }
  func.func @transform_2(%arg0: i32, %arg1: i32) -> (i32, i32) {
    %c0_i32 = arith.constant 0 : i32
    %c0_i32_0 = arith.constant 0 : i32
    %c0_i32_1 = arith.constant 0 : i32
    return %c0_i32, %c0_i32_0 : i32, i32
  }
  func.func @transform_3(%arg0: i32, %arg1: i32) -> (i32, i32) {
    %c0_i32 = arith.constant 0 : i32
    %c0_i32_0 = arith.constant 0 : i32
    return %arg0, %c0_i32 : i32, i32
  }
  func.func @transform_4(%arg0: i32, %arg1: i32) -> (i32, i32, i32) {
    %c0_i32 = arith.constant 0 : i32
    %c0_i32_0 = arith.constant 0 : i32
    return %arg1, %arg0, %c0_i32 : i32, i32, i32
  }
}

</mosaic_0001>

<bundles_post_ra>
// kernel: tpu_custom_call.1
= control target key start
LH: loop header
LB: loop body
LE: loop exit
PB: predicated region body
PF: predicated region fallthrough
CT: control target
= control target key end

     0   :  { %s3187_s0 = inlined_call_operand.hbm [shape: f32[2,64,288], index: 0, kind: input, shape index: {}]   ;;  %s3188_s1 = inlined_call_operand.hbm [shape: bf16[64,128], index: 1, kind: input, shape index: {}]   ;;  %s3189_s2 = inlined_call_operand.hbm [shape: f32[2,128], index: 2, kind: input, shape index: {}]   ;;  %s3190_s3 = inlined_call_operand.hbm [shape: f32[288,128], index: 3, kind: input, shape index: {}]   ;;  %s3191_s4 = inlined_call_operand.hbm [shape: f32[2,288,128], index: 4, kind: output, shape index: {}]  }
   0x1   :  { %3203 = sst [smem:[#allocation26_spill]] %s3188_s1 }
   0x2   :  { %3204 = sst [smem:[#allocation27_spill]] %s3189_s2 }
   0x3   :  { %3205 = sst [smem:[#allocation28_spill]] %s3191_s4 }
   0x4   :  { %9 = vsyncpa [#allocation3], 0 }
   0x5   :  { %11 = vsyncpa [#allocation3 + $0x1], 0 }
   0x6   :  { %12 = vsyncpa [#allocation6], 0 }
   0x7   :  { %13 = vsyncpa [#allocation9], 0 }
   0x8   :  { %15 = vsyncpa [#allocation9 + $0x1], 0 }
   0x9   :  { %16 = vsyncpa [#allocation4], 0 }
   0xa   :  { %18 = vsyncpa [#allocation4 + $0x1], 0  ;;  %s2095_s15 = smov 0   ;;  %s2097_s16 = smov 0  }
   0xb   :  { %s2099_s17 = smov 0   ;;  %s2101_s18 = smov 0  }
   0xc   :  { %s2103_s19 = smov 0   ;;  %s2105_s20 = smov 0  }
   0xd   :  { %s2107_s21 = smov 0   ;;  %s2109_s22 = smov 0  }
   0xe   :  { %s2111_s23 = smov 0   ;;  %s2113_s24 = smov 0  }
   0xf   :  { %s2115_s25 = smov 0  }
  0x10 LB: > { %3206 = sst [smem:[#allocation15_spill]] %s2026_s18  ;;  %s1493_s26 = sadd.s32 4294967295, %s2054_s25   ;;  %s2054_s25 = sphi %s2115_s25, %s24_s25   ;;  %s2050_s24 = sphi %s2113_s24, %s3250_s24   ;;  %s2046_s23 = sphi %s2111_s23, %s3242_s23   ;;  %s2042_s22 = sphi %s2109_s22, %s3249_s22   ;;  %s2038_s21 = sphi %s2107_s21, %s3241_s21   ;;  %s2034_s20 = sphi %s2105_s20, %s3240_s20   ;;  %s2030_s19 = sphi %s2103_s19, %s3248_s19   ;;  %s2026_s18 = sphi %s2101_s18, %s3247_s18   ;;  %s2022_s17 = sphi %s2099_s17, %s3246_s17   ;;  %s2018_s16 = sphi %s2097_s16, %s3245_s16   ;;  %s2014_s15 = sphi %s2095_s15, %s3244_s15  }
  0x11   : > { %3207 = sst [smem:[#allocation16_spill]] %s2034_s20  ;;  %s1494_s27 = sadd.s32 4294967294, %s2054_s25  }
  0x12   : > { %3208 = sst [smem:[#allocation17_spill]] %s2038_s21  ;;  %s33_s28 = sadd.s32 1, %s2046_s23 }
  0x13   : > { %3209 = sst [smem:[#allocation18_spill]] %s2042_s22  ;;  %s36_s29 = sadd.s32 1, %s2050_s24 }
  0x14   : > { %3210 = sst [smem:[#allocation19_spill]] %s2046_s23  ;;  %p34_p0 = scmp.ge.s32.totalorder %s33_s28, 2 }
  0x15   : > { %3211 = sst [smem:[#allocation20_spill]] %s2054_s25  ;;  %s45_s30 = sadd.s32 1, %s2034_s20 }
  0x16   : > { %p52_p1 = scmp.ne.s32.totalorder %s2034_s20, %s2030_s19  ;;  %p53_p2 = scmp.eq.s32.totalorder %s2054_s25, 0 }
  0x17   : > { %s3252_s28 = smov (%p34_p0, %s33_s28), 0  ;;  %s3254_s29 = smov (!%p34_p0, %s36_s29), %s2050_s24 }
  0x18   : > { %3212 = sst [smem:[#allocation21_spill]] %s3252_s28  ;;  %s40_s5 = ssub.s32 %s2046_s23, %s3252_s28 }
  0x19   : > { %p2168_p3 = por %p53_p2, %p52_p1  ;;  %p38_p4 = scmp.ge.s32.totalorder %s3254_s29, 2 }
  0x1a   : > { %p3193_p5 = scmp.ne.s32.totalorder %s2030_s19, %s2026_s18  ;;  %p2174_p6 = scmp.eq.s32.totalorder %s1493_s26, 0 }
  0x1b   : > { %s113_s8 = sadd.s32 1, %s2022_s17  ;;  %s3256_s29 = smov (%p38_p4, %s3254_s29), 0 }
  0x1c   : > { %3215 = sst [smem:[#allocation22_spill]] %s3256_s29  ;;  %p2186_p7 = por %p2174_p6, %p3193_p5 }
  0x1d   : > { %p120_p8 = scmp.ne.s32.totalorder %s2022_s17, %s2018_s16  ;;  %s41_s10 = ssub.s32 %s2050_s24, %s3256_s29 }
  0x1e   : > { %s3216_s9 = scalar_select %p2186_p7, 1, 0 }
  0x1f   : > { %p126_p9 = scmp.ne.s32.totalorder %s2018_s16, %s2014_s15  ;;  %s42_s11 = sor.u32 %s41_s10, %s40_s5 }
  0x20   : > { %p111_p10 = scmp.eq.s32.totalorder %s41_s10, 0  ;;  %p43_p11 = scmp.eq.s32.totalorder %s42_s11, 0 }
  0x21   : > { %p2198_p12 = por %p120_p8, %p53_p2  ;;  %p2210_p13 = por %p126_p9, %p2174_p6 }
  0x22   : > { %s2203_s13 = scalar_select %p111_p10, %s2022_s17, %s113_s8  }
  0x23   : > { %s2206_s14 = scalar_select %p43_p11, %s2034_s20, %s45_s30  }
  0x24   : > { %3218 = sst [smem:[#allocation23_spill]] %s2203_s13  ;;  %p152_p0 = scmp.eq.s32.totalorder %s1493_s26, 3 }
  0x25   : > { %3219 = sst [smem:[#allocation24_spill]] %s2206_s14  ;;  %p158_p4 = scmp.eq.s32.totalorder %s1494_s27, 3 }
  0x26   : > { %p1495_p5 = scmp.ge.s32.totalorder %s2054_s25, 1  ;;  %p2218_p7 = por %p152_p0, %p52_p1 }
  0x27   : > { %p165_p2 = scmp.lt.s32.totalorder %s2054_s25, 5  ;;  %p3222_p8 = scmp.ne.s32.totalorder %s2030_s19, %s2026_s18 }
  0x28   : > { %s3226_s1 = sld [smem:[#allocation26_spill]]  ;;  %s2056_s27 = smov [#allocation5]  }
  0x29   : > { %p2226_p10 = por %p158_p4, %p3222_p8  ;;  %p2230_p11 = pnand %p1495_p5, %p165_p2 }
  0x2a   : > { %s178_s11 = sshll.u32 %s2056_s27, 4  ;;  %s3227_s2 = sld [smem:[#allocation27_spill]]  ;;  %s179_s11 = int_to_ptr.vmem [resolvable:$true] %s178_s11 }
  0x2b   : > { %s3223_s5 = scalar_select %p2226_p10, 1, 0 }
  0x2c   : > { %p1593_p1 = pneg %p2230_p11  ;;  %s2058_s18 = smov 4  }
  0x2d   : > { %3224 = sst [smem:[#allocation25_spill]] %s3223_s5  ;;  %s2057_s5 = smov 64  }
  0x2e   : > { %s176_s26 = sshll.u32 %s3226_s1, 4  ;;  %p1594_p9 = pnand %p1593_p1, %p2174_p6  ;;  %s177_s26 = int_to_ptr.hbm [resolvable:$true] %s176_s26 }
  0x2f   : > { %s2059_s4 = smov [#allocation7]   ;;  %p1498_p5 = scmp.ge.s32.totalorder %s2054_s25, 4 }
  0x30   : > { %s191_s13 = sshll.u32 %s3227_s2, 4  ;;  %s193_s8 = sshll.u32 %s2059_s4, 4  ;;  %s192_s13 = int_to_ptr.hbm [resolvable:$true] %s191_s13  ;;  %s194_s8 = int_to_ptr.vmem [resolvable:$true] %s193_s8 }
  0x31   : > { %1596 = dma.hbm_to_vmem [thread:$0]  (!%p1594_p9), %s177_s26, 512, %s179_s11, [#allocation6], %s2057_s5, %s2057_s5, %s2058_s18  }
  0x32   : > { %1599 = dma.hbm_to_vmem [thread:$0]  (!%p1594_p9), %s192_s13, 32, %s194_s8, [#allocation6]  }
  0x33   : > { %200 = sbr.rel (%p1498_p5) target bundleno = 118 (0x76), region = 24 }
  0x38   : > { %203 = sbr.rel (!%p2168_p3) target bundleno = 82 (0x52), region = 28  ;;  %s204_s10 = sand.u32 (%p2168_p3), 1, %s2034_s20  }
  0x39   : > { %s1500_s27 = sshll.u32 (%p2168_p3), %s2050_s24, 1  ;;  %s1499_s29 = sshll.u32 (%p2168_p3), %s204_s10, 7 }
  0x3a   : > { %s210_s14 = ssub.s32 (%p2168_p3), 3, %s1500_s27  ;;  %s2252_s13 = scalar_lea.sflag (%p2168_p3), [#allocation3], %s204_s10 }
  0x3b   : > { %p211_p0 = scmp.lt.s32.totalorder (%p2168_p3), %s210_s14, 2  ;;  %s208_s26 = scalar_lea.vmem (%p2168_p3), [#allocation2], %s1499_s29 }
  0x3d   : > { %s3258_s14 = smov (!%p211_p0, %s210_s14), 2 }
  0x3e   : > { %s1501_s18 = sshll.u32 %s3258_s14, 6 }
  0x3f   : > { %s214_s4 = ssub.s32 128, %s1501_s18 }
  0x40   : > { %s215_s5 = sshll.u32 %s214_s4, 4 }
  0x41   : > { %216 = vsyncadd %s2252_s13, %s215_s5  ;;  %p2255_p3 = scmp.ne.s32.totalorder %s1501_s18, 0  ;;  %s1580_s11 = smul.u32 24, %s2046_s23 }
  0x42   : > { %s1504_s8 = sshll.u32 %s3258_s14, 3  ;;  %s226_s1 = sshll.u32 %s208_s26, 4  ;;  %s227_s1 = int_to_ptr.vmem [resolvable:$true] %s226_s1 }
  0x43   : > { %s219_s2 = sadd.s32 %s1580_s11, %s1500_s27  ;;  %s1562_s4 = sshll.u32 %s3258_s14, 10 }
  0x44   : > { %s1503_s20 = sshll.u32 %s219_s2, 3  ;;  %s1837_s21 = sshrl.u32 %s1562_s4, 4 }
  0x45   : > { %s221_s29 = scalar_lea.hbm %s3187_s0, %s1503_s20  ;;  %s1854_s22 = sshra.s32 %s227_s1, 4  ;;  %s1855_s22 = int_to_ptr.vmem [resolvable:$true] %s1854_s22 }
  0x46   : > { %s224_s5 = sshll.u32 %s221_s29, 4  ;;  %s1861_s18 = scalar_lea.vmem %s1855_s22, %s1837_s21  ;;  %s225_s5 = int_to_ptr.hbm [resolvable:$true] %s224_s5 }
  0x47   : > { %p1862_p4 = scmp.ne.s32.totalorder %s1855_s22, %s1861_s18  ;;  %s2060_s23 = smov [#allocation2]  }
  0x48   : > { %s1865_s26 = scalar_lea.vmem %s2060_s23, 256 }
  0x49   : > { %p1863_p2 = pnand %p1862_p4, %p2255_p3  ;;  %p1867_p1 = scmp.lt.s32.totalorder %s1865_s26, %s1861_s18 }
  0x4b   : > { %p1864_p8 = pneg %p1863_p2 }
  0x4d   : > { %p1869_p9 = pnand %p1867_p1, %p1864_p8 }
  0x4f   : > { %1872 = shalt.err (!%p1869_p9)
}
  0x50   : > { %s2061_s2 = smov 384   ;;  %s2062_s25 = smov 256  }
  0x51   : > { %232 = dma.hbm_to_vmem [thread:$0]  (%p2255_p3), %s225_s5, %s1562_s4, %s227_s1, %s2252_s13, %s2061_s2, %s2062_s25, %s1504_s8  }
  0x52 PF: > { %235 = sbr.rel (!%p2198_p12) target bundleno = 118 (0x76), region = 32  ;;  %s236_s20 = sand.u32 (%p2198_p12), 1, %s2022_s17  }
  0x53   : > { %s1508_s21 = sshll.u32 (%p2198_p12), %s2050_s24, 5  ;;  %s1507_s22 = sshll.u32 (%p2198_p12), %s236_s20, 8 }
  0x54   : > { %s242_s27 = ssub.s32 (%p2198_p12), 36, %s1508_s21  ;;  %s2277_s10 = scalar_lea.sflag (%p2198_p12), [#allocation9], %s236_s20 }
  0x55   : > { %p243_p5 = scmp.lt.s32.totalorder (%p2198_p12), %s242_s27, 32  ;;  %s240_s1 = scalar_lea.vmem (%p2198_p12), [#allocation8], %s1507_s22 }
  0x57   : > { %s3260_s27 = smov (!%p243_p5, %s242_s27), 32 }
  0x58   : > { %s1509_s23 = sshll.u32 %s3260_s27, 3 }
  0x59   : > { %s246_s14 = ssub.s32 256, %s1509_s23 }
  0x5a   : > { %s247_s11 = sshll.u32 %s246_s14, 4 }
  0x5b   : > { %248 = vsyncadd %s2277_s10, %s247_s11  ;;  %p2280_p12 = scmp.ne.s32.totalorder %s1509_s23, 0  ;;  %s1563_s13 = sshll.u32 %s2050_s24, 8 }
  0x5c   : > { %s251_s4 = scalar_lea.hbm %s3190_s3, %s1563_s13  ;;  %s2288_s29 = sshll.u32 %s240_s1, 4  ;;  %s256_s29 = int_to_ptr.vmem [resolvable:$true] %s2288_s29 }
  0x5d   : > { %s253_s5 = sshll.u32 %s251_s4, 4  ;;  %s1513_s18 = sshll.u32 %s3260_s27, 7  ;;  %s2291_s5 = int_to_ptr.hbm [resolvable:$true] %s253_s5 }
  0x5e   : > { %s1874_s26 = sshra.s32 %s2291_s5, 4  ;;  %s1876_s2 = sshrl.u32 %s1513_s18, 4  ;;  %s1875_s26 = int_to_ptr.hbm [resolvable:$true] %s1874_s26 }
  0x5f   : > { %s1881_s25 = scalar_lea.hbm %s1875_s26, %s1876_s2  ;;  %s1885_s22 = scalar_lea.hbm %s3190_s3, 288 }
  0x60   : > { %p1882_p0 = scmp.ne.s32.totalorder %s1875_s26, %s1881_s25  ;;  %p1887_p2 = scmp.lt.s32.totalorder %s1885_s22, %s1881_s25 }
  0x62   : > { %p1883_p3 = pnand %p1882_p0, %p2280_p12 }
  0x64   : > { %p1884_p4 = pneg %p1883_p3 }
  0x66   : > { %p1889_p8 = pnand %p1887_p2, %p1884_p4 }
  0x68   : > { %1892 = shalt.err (!%p1889_p8)
}
  0x69   : > { %s1893_s23 = sshra.s32 %s256_s29, 4  ;;  %s2063_s11 = smov [#allocation8]   ;;  %s1894_s23 = int_to_ptr.vmem [resolvable:$true] %s1893_s23 }
  0x6a   : > { %s1900_s14 = scalar_lea.vmem %s1894_s23, %s1876_s2  ;;  %s1904_s1 = scalar_lea.vmem %s2063_s11, 512 }
  0x6b   : > { %p1901_p1 = scmp.ne.s32.totalorder %s1894_s23, %s1900_s14  ;;  %p1906_p0 = scmp.lt.s32.totalorder %s1904_s1, %s1900_s14 }
  0x6d   : > { %p1902_p9 = pnand %p1901_p1, %p2280_p12 }
  0x6f   : > { %p1903_p5 = pneg %p1902_p9 }
  0x71   : > { %p1908_p3 = pnand %p1906_p0, %p1903_p5 }
  0x73   : > { %1911 = shalt.err (!%p1908_p3)
}
  0x74   : > { %s2064_s13 = smov 128   ;;  %s2065_s6 = smov 8  }
  0x75   : > { %261 = dma.hbm_to_vmem [thread:$0]  (%p2280_p12), %s2291_s5, %s1513_s18, %s256_s29, %s2277_s10, %s2064_s13, %s2064_s13, %s2065_s6  }
  0x76 PF: > { %267 = sbr.rel (%p2230_p11) target bundleno = 958 (0x3be), region = 36  ;;  %s2317_s8 = sand.u32 (!%p2230_p11), 1, %s2030_s19  }
  0x77   : > { %s1515_s4 = sshll.u32 (!%p2230_p11), %s2317_s8, 7  ;;  %s270_s26 = scalar_lea.sflag (!%p2230_p11), [#allocation3], %s2317_s8 }
  0x78   : > { %s2321_s2 = scalar_lea.vmem (!%p2230_p11), [#allocation2], %s1515_s4  ;;  %p3230_p4 = scmp.ne.s32.totalorder (!%p2230_p11), %s3216_s9, 0 }
  0x7b   : > { %1997 = dma.done.wait (%p3230_p4), %s270_s26, 2048  }
  0x7c   : > { %1999 = vsyncadd (%p3230_p4), %s270_s26, 4294965248 }
  0x7d   : > { %2001 = dma.done.wait (%p2174_p6), [#allocation6], 544  }
  0x7e   : > { %2003 = vsyncadd (%p2174_p6), [#allocation6], 4294966752  ;;  %s289_s30 = sand.u32 1, %s2018_s16  }
  0x7f   : > { %s1518_s27 = sshll.u32 %s289_s30, 8  ;;  %s290_s10 = scalar_lea.sflag [#allocation9], %s289_s30 }
  0x80   : > { %s2332_s12 = scalar_lea.vmem [#allocation8], %s1518_s27 }
  0x81   : > { %2005 = dma.done.wait (%p2210_p13), %s290_s10, 4096  }
  0x82   : > { %2007 = vsyncadd (%p2210_p13), %s290_s10, 4294963200  ;;  %v340_v0 = vld [vmem:[%s2321_s2] sm:$0xff]  ;;  %v341_v1 = vld [vmem:[%s2321_s2 + $0x8] sm:$0xff]  ;;  %vm422_vm0 = vcmask 523264   ;;  %s1519_s28 = sshll.u32 %s2317_s8, 8  ;;  %s1337_s9 = scalar_lea.sflag [#allocation4], %s2317_s8 }
  0x83   : > { %v342_v2 = vld [vmem:[%s2321_s2 + $0x10] sm:$0xff]  ;;  %v343_v3 = vld [vmem:[%s2321_s2 + $0x18] sm:$0xff]  ;;  %v344_v6 = vld [vmem:[%s2321_s2 + $0x20] sm:$0xff]  ;;  %s2695_s7 = scalar_lea.vmem [#allocation10], %s1519_s28  ;;  %s3231_s29 = sld [smem:[#allocation18_spill]] (%p2218_p7) }
  0x84   : > { %v356_v4 = vpack.c.bf16 %v342_v2, %v340_v0  ;;  %v357_v5 = vpack.c.bf16 %v343_v3, %v341_v1  ;;  %v345_v7 = vld [vmem:[%s2321_s2 + $0x28] sm:$0xff]  ;;  %v346_v8 = vld [vmem:[%s2321_s2 + $0x30] sm:$0xff]  ;;  %v347_v9 = vld [vmem:[%s2321_s2 + $0x38] sm:$0xff] }
  0x85   : > { %v358_v10 = vpack.c.bf16 %v346_v8, %v344_v6  ;;  %v359_v11 = vpack.c.bf16 %v347_v9, %v345_v7  ;;  %v1567_v12 = vld [vmem:[#allocation5 + $0x18] sm:$0xff]  ;;  %v1566_v13 = vld [vmem:[#allocation5 + $0x10] sm:$0xff]  ;;  %v1565_v14 = vld [vmem:[#allocation5 + $0x8] sm:$0xff] }
  0x86   : > { %374 = vxpose.binary.xlu0.c.b16.start [1/8] (short) %v357_v5, %v356_v4, 128  ;;  %v348_v15 = vld [vmem:[%s2321_s2 + $0x40] sm:$0xff]  ;;  %v349_v16 = vld [vmem:[%s2321_s2 + $0x48] sm:$0xff]  ;;  %v350_v17 = vld [vmem:[%s2321_s2 + $0x50] sm:$0xff] }
  0x87   : > { %475 = vmatpush.bf16.msra.mxu0 %v1567_v12  ;;  %1569 = vmatpush.bf16.msra.mxu2 %v1567_v12  ;;  %v351_v18 = vld [vmem:[%s2321_s2 + $0x58] sm:$0xff]  ;;  %v1564_v19 = vld [vmem:[#allocation5] sm:$0xff]  ;;  %v360_v20 = vpack.c.bf16 %v350_v17, %v348_v15  ;;  %v353_v23 = vld [vmem:[%s2321_s2 + $0x68] sm:$0xff] }
  0x88   : > { %1568 = vmatpush.bf16.msra.mxu1 %v1567_v12  ;;  %1570 = vmatpush.bf16.msra.mxu3 %v1567_v12  ;;  %v361_v21 = vpack.c.bf16 %v351_v18, %v349_v16  ;;  %v352_v22 = vld [vmem:[%s2321_s2 + $0x60] sm:$0xff]  ;;  %v354_v24 = vld [vmem:[%s2321_s2 + $0x70] sm:$0xff]  ;;  %v355_v25 = vld [vmem:[%s2321_s2 + $0x78] sm:$0xff] }
  0x89   : > { %v362_v26 = vpack.c.bf16 %v354_v24, %v352_v22  ;;  %v363_v27 = vpack.c.bf16 %v355_v25, %v353_v23  ;;  %v2369_v43 = vld [vmem:[#allocation7] sm:$0x3]  ;;  %s1553_s5 = sshll.u32 (%p2218_p7), %s3231_s29, 5 }
  0x8a   : > { %v2372_v44 = vperm.slane %v2369_v43, 0  ;;  %s1345_s18 = ssub.s32 (%p2218_p7), 36, %s1553_s5 }
  0x8b   : > { %476 = vmatpush.bf16.msra.mxu0 %v1566_v13  ;;  %1572 = vmatpush.bf16.msra.mxu2 %v1566_v13  ;;  %p1346_p6 = scmp.lt.s32.totalorder (%p2218_p7), %s1345_s18, 32 }
  0x8c   : > { %1571 = vmatpush.bf16.msra.mxu1 %v1566_v13  ;;  %1573 = vmatpush.bf16.msra.mxu3 %v1566_v13 }
  0x8f   : > { %477 = vmatpush.bf16.msra.mxu0 %v1565_v14  ;;  %1575 = vmatpush.bf16.msra.mxu2 %v1565_v14 }
  0x90   : > { %1574 = vmatpush.bf16.msra.mxu1 %v1565_v14  ;;  %1576 = vmatpush.bf16.msra.mxu3 %v1565_v14 }
  0x93   : > { %478 = vmatpush.bf16.msra.mxu0 %v1564_v19  ;;  %1578 = vmatpush.bf16.msra.mxu2 %v1564_v19 }
  0x94   : > { %1577 = vmatpush.bf16.msra.mxu1 %v1564_v19  ;;  %1579 = vmatpush.bf16.msra.mxu3 %v1564_v19 }
  0x96   : > { %375 = vxpose.binary.xlu0.c.b16.cont [2/8] (short) %v359_v11, %v358_v10, 128 }
  0xa6   : > { %376 = vxpose.binary.xlu0.c.b16.cont [3/8] (short) %v361_v21, %v360_v20, 128 }
  0xb6   : > { %377 = vxpose.binary.xlu0.c.b16.end [4/8] (short) %v363_v27, %v362_v26, 128 }
 0x132   : > { %v382_v28 = vpop.trf.xlu0 }
 0x133   : > { %1536 = vmatmul.msk.bf16.vlgmr.msra.gmra.mxu0 %vm422_vm0, %v382_v28 }
 0x13a   : > { %v383_v29 = vpop.trf.xlu0 }
 0x13b   : > { %1544 = vmatmul.msk.bf16.vlgmr.msra.gmra.mxu2 %vm422_vm0, %v383_v29 }
 0x142   : > { %v384_v30 = vpop.trf.xlu0 }
 0x143   : > { %1537 = vmatmul.msk.bf16.gmra.mxu0 %vm422_vm0, %v384_v30 }
 0x14a   : > { %v385_v31 = vpop.trf.xlu0 }
 0x14b   : > { %1545 = vmatmul.msk.bf16.gmra.mxu2 %vm422_vm0, %v385_v31  ;;  %v2066_v31 = vmov 128.0  }
 0x14c   : > { %1709 = vrcp.f32 %v2066_v31 }
 0x152   : > { %v386_v32 = vpop.trf.xlu0 }
 0x153   : > { %1538 = vmatmul.msk.bf16.gmra.mxu0 %vm422_vm0, %v386_v32 }
 0x15a   : > { %v387_v33 = vpop.trf.xlu0 }
 0x15b   : > { %1546 = vmatmul.msk.bf16.gmra.mxu2 %vm422_vm0, %v387_v33 }
 0x162   : > { %v388_v34 = vpop.trf.xlu0 }
 0x163   : > { %1539 = vmatmul.msk.bf16.gmra.mxu0 %vm422_vm0, %v388_v34 }
 0x16a   : > { %v389_v35 = vpop.trf.xlu0 }
 0x16b   : > { %1547 = vmatmul.msk.bf16.gmra.mxu2 %vm422_vm0, %v389_v35  ;;  %v1710_v35 = vpop.eup %1709 }
 0x16c   : > { %vm629_vm1 = vweird.f32 %v1710_v35 }
 0x172   : > { %v390_v36 = vpop.trf.xlu0 }
 0x173   : > { %1540 = vmatmul.msk.bf16.vlgmr.msra.gmra.mxu1 %vm422_vm0, %v390_v36  ;;  %v625_v36 = vmul.f32 128.0, %v1710_v35 }
 0x17a   : > { %v391_v37 = vpop.trf.xlu0 }
 0x17b   : > { %1548 = vmatmul.msk.bf16.vlgmr.msra.gmra.mxu3 %vm422_vm0, %v391_v37 }
 0x182   : > { %v392_v38 = vpop.trf.xlu0 }
 0x183   : > { %1541 = vmatmul.msk.bf16.gmra.mxu1 %vm422_vm0, %v392_v38 }
 0x18a   : > { %v393_v39 = vpop.trf.xlu0 }
 0x18b   : > { %1549 = vmatmul.msk.bf16.gmra.mxu3 %vm422_vm0, %v393_v39  ;;  %v626_v39 = vsub.f32 1.0, %v625_v36 }
 0x192   : > { %v394_v40 = vpop.trf.xlu0 }
 0x193   : > { %1542 = vmatmul.msk.bf16.gmra.mxu1 %vm422_vm0, %v394_v40 }
 0x19a   : > { %v395_v41 = vpop.trf.xlu0 }
 0x19b   : > { %1550 = vmatmul.msk.bf16.gmra.mxu3 %vm422_vm0, %v395_v41 }
 0x1a2   : > { %v396_v42 = vpop.trf.xlu0 }
 0x1a3   : > { %1543 = vmatmul.msk.bf16.gmra.mxu1 %vm422_vm0, %v396_v42  ;;  %v627_v42 = vmul.f32 %v1710_v35, %v626_v39 }
 0x1aa   : > { %v397_v47 = vpop.trf.xlu0 }
 0x1ab   : > { %1551 = vmatmul.msk.bf16.gmra.mxu3 %vm422_vm0, %v397_v47 }
 0x1b0   : > { %v480_v45 = vpop.f32.mrf.mxu0 }
 0x1b1   : > { %v2375_v46 = vadd.f32 %v480_v45, %v2372_v44 }
 0x1b3   : > { %560 = vadd.xlane.f32.xlu1 %v2375_v46 }
 0x1b8   : > { %v482_v48 = vpop.f32.mrf.mxu0 }
 0x1b9   : > { %v2380_v49 = vadd.f32 %v482_v48, %v2372_v44  ;;  %v628_v48 = vadd.f32 %v1710_v35, %v627_v42 }
 0x1bb   : > { %562 = vadd.xlane.f32.xlu1 %v2380_v49 }
 0x1be   : > { %v520_v60 = vpop.f32.mrf.mxu2 }
 0x1bf   : > { %v2436_v20 = vadd.f32 %v520_v60, %v2372_v44 }
 0x1c0   : > { %v485_v50 = vpop.f32.mrf.mxu0 }
 0x1c1   : > { %v2384_v51 = vadd.f32 %v485_v50, %v2372_v44 }
 0x1c3   : > { %564 = vadd.xlane.f32.xlu2 %v2384_v51 }
 0x1c6   : > { %v522_v1 = vpop.f32.mrf.mxu2 }
 0x1c7   : > { %v2428_v15 = vadd.f32 %v522_v1, %v2372_v44 }
 0x1c8   : > { %v487_v52 = vpop.f32.mrf.mxu0 }
 0x1c9   : > { %v2388_v53 = vadd.f32 %v487_v52, %v2372_v44  ;;  %v2487_v52 = vsel %vm629_vm1, %v1710_v35, %v628_v48 }
 0x1cb   : > { %566 = vadd.xlane.f32.xlu2 %v2388_v53 }
 0x1ce   : > { %v525_v4 = vpop.f32.mrf.mxu2 }
 0x1cf   : > { %v2448_v25 = vadd.f32 %v525_v4, %v2372_v44 }
 0x1d0   : > { %v490_v54 = vpop.f32.mrf.mxu0 }
 0x1d1   : > { %v2392_v55 = vadd.f32 %v490_v54, %v2372_v44 }
 0x1d3   : > { %568 = vadd.xlane.f32.xlu1 %v2392_v55 }
 0x1d6   : > { %v527_v7 = vpop.f32.mrf.mxu2 }
 0x1d7   : > { %v2439_v21 = vadd.f32 %v527_v7, %v2372_v44 }
 0x1d8   : > { %v492_v56 = vpop.f32.mrf.mxu0 }
 0x1d9   : > { %v2396_v57 = vadd.f32 %v492_v56, %v2372_v44 }
 0x1db   : > { %570 = vadd.xlane.f32.xlu2 %v2396_v57 }
 0x1de   : > { %v530_v10 = vpop.f32.mrf.mxu2 }
 0x1df   : > { %v2456_v28 = vadd.f32 %v530_v10, %v2372_v44 }
 0x1e0   : > { %v495_v58 = vpop.f32.mrf.mxu0 }
 0x1e1   : > { %v2400_v59 = vadd.f32 %v495_v58, %v2372_v44 }
 0x1e3   : > { %572 = vadd.xlane.f32.xlu1 %v2400_v59 }
 0x1e6   : > { %v532_v17 = vpop.f32.mrf.mxu2 }
 0x1e7   : > { %v2451_v26 = vadd.f32 %v532_v17, %v2372_v44 }
 0x1e8   : > { %v497_v61 = vpop.f32.mrf.mxu0 }
 0x1e9   : > { %v2404_v62 = vadd.f32 %v497_v61, %v2372_v44 }
 0x1eb   : > { %574 = vadd.xlane.f32.xlu2 %v2404_v62 }
 0x1ee   : > { %v535_v23 = vpop.f32.mrf.mxu2 }
 0x1ef   : > { %v2464_v32 = vadd.f32 %v535_v23, %v2372_v44 }
 0x1f0   : > { %v500_v63 = vpop.f32.mrf.mxu1 }
 0x1f1   : > { %v2408_v0 = vadd.f32 %v500_v63, %v2372_v44 }
 0x1f3   : > { %576 = vadd.xlane.f32.xlu1 %v2408_v0 }
 0x1f6   : > { %v537_v27 = vpop.f32.mrf.mxu2 }
 0x1f7   : > { %v2459_v29 = vadd.f32 %v537_v27, %v2372_v44 }
 0x1f8   : > { %v502_v2 = vpop.f32.mrf.mxu1 }
 0x1f9   : > { %v2412_v3 = vadd.f32 %v502_v2, %v2372_v44 }
 0x1fb   : > { %578 = vadd.xlane.f32.xlu2 %v2412_v3 }
 0x1fe   : > { %v540_v13 = vpop.f32.mrf.mxu3 }
 0x1ff   : > { %v2472_v37 = vadd.f32 %v540_v13, %v2372_v44 }
 0x200   : > { %v505_v5 = vpop.f32.mrf.mxu1 }
 0x201   : > { %v2416_v6 = vadd.f32 %v505_v5, %v2372_v44 }
 0x203   : > { %580 = vadd.xlane.f32.xlu1 %v2416_v6 }
 0x206   : > { %v542_v18 = vpop.f32.mrf.mxu3 }
 0x207   : > { %v2467_v33 = vadd.f32 %v542_v18, %v2372_v44 }
 0x208   : > { %v507_v8 = vpop.f32.mrf.mxu1 }
 0x209   : > { %v2420_v9 = vadd.f32 %v507_v8, %v2372_v44 }
 0x20b   : > { %582 = vadd.xlane.f32.xlu2 %v2420_v9 }
 0x20e   : > { %v545_v24 = vpop.f32.mrf.mxu3 }
 0x20f   : > { %v2483_v47 = vadd.f32 %v545_v24, %v2372_v44 }
 0x210   : > { %v510_v11 = vpop.f32.mrf.mxu1 }
 0x211   : > { %v2424_v12 = vadd.f32 %v510_v11, %v2372_v44 }
 0x213   : > { %584 = vadd.xlane.f32.xlu1 %v2424_v12 }
 0x216   : > { %v547_v30 = vpop.f32.mrf.mxu3 }
 0x217   : > { %v2475_v38 = vadd.f32 %v547_v30, %v2372_v44 }
 0x218   : > { %v512_v14 = vpop.f32.mrf.mxu1 }
 0x219   : > { %v2431_v16 = vadd.f32 %v512_v14, %v2372_v44 }
 0x21b   : > { %586 = vadd.xlane.f32.xlu2 %v2431_v16  ;;  %594 = vadd.xlane.f32.xlu1 %v2428_v15 }
 0x21e   : > { %v550_v34 = vpop.f32.mrf.mxu3 }
 0x21f   : > { %v2490_v56 = vadd.f32 %v550_v34, %v2372_v44 }
 0x220   : > { %v515_v19 = vpop.f32.mrf.mxu1 }
 0x221   : > { %v2442_v22 = vadd.f32 %v515_v19, %v2372_v44 }
 0x223   : > { %592 = vadd.xlane.f32.xlu2 %v2436_v20  ;;  %598 = vadd.xlane.f32.xlu1 %v2439_v21 }
 0x224   : > { %588 = vadd.xlane.f32.xlu0 %v2442_v22 }
 0x226   : > { %v561_v40 = vpop.xlane.xlu1 %560  ;;  %v552_v41 = vpop.f32.mrf.mxu3 }
 0x227   : > { %v2480_v45 = vadd.f32 %v552_v41, %v2372_v44  ;;  %v631_v60 = vmul.f32 %v2487_v52, %v561_v40 }
 0x228   : > { %v517_v50 = vpop.f32.mrf.mxu1 }
 0x229   : > { %v2493_v58 = vadd.f32 %v517_v50, %v2372_v44  ;;  %v2500_v1 = vsub.f32 %v2375_v46, %v631_v60 }
 0x22b   : > { %596 = vadd.xlane.f32.xlu2 %v2448_v25  ;;  %602 = vadd.xlane.f32.xlu1 %v2451_v26  ;;  %v695_v4 = vmul.f32 %v2500_v1, %v2500_v1 }
 0x22e   : > { %v563_v54 = vpop.xlane.xlu1 %562  ;;  %v555_v63 = vpop.f32.mrf.mxu3 }
 0x22f   : > { %v632_v61 = vmul.f32 %v2487_v52, %v563_v54  ;;  %v2510_v10 = vadd.f32 %v555_v63, %v2372_v44 }
 0x231   : > { %v2503_v2 = vsub.f32 %v2380_v49, %v632_v61 }
 0x233   : > { %600 = vadd.xlane.f32.xlu2 %v2456_v28  ;;  %606 = vadd.xlane.f32.xlu1 %v2459_v29  ;;  %v696_v5 = vmul.f32 %v2503_v2, %v2503_v2 }
 0x236   : > { %v565_v7 = vpop.xlane.xlu2 %564  ;;  %v557_v8 = vpop.f32.mrf.mxu3 }
 0x237   : > { %v2513_v11 = vadd.f32 %v557_v8, %v2372_v44  ;;  %v633_v50 = vmul.f32 %v2487_v52, %v565_v7 }
 0x239   : > { %v2550_v63 = vsub.f32 %v2384_v51, %v633_v50 }
 0x23b   : > { %604 = vadd.xlane.f32.xlu2 %v2464_v32  ;;  %610 = vadd.xlane.f32.xlu1 %v2467_v33  ;;  %v697_v8 = vmul.f32 %v2550_v63, %v2550_v63 }
 0x23e   : > { %v567_v46 = vpop.xlane.xlu2 %566 }
 0x23f   : > { %v634_v35 = vmul.f32 %v2487_v52, %v567_v46 }
 0x241   : > { %v2537_v41 = vsub.f32 %v2388_v53, %v634_v35 }
 0x243   : > { %608 = vadd.xlane.f32.xlu2 %v2472_v37  ;;  %614 = vadd.xlane.f32.xlu1 %v2475_v38  ;;  %v698_v54 = vmul.f32 %v2537_v41, %v2537_v41 }
 0x246   : > { %v569_v49 = vpop.xlane.xlu1 %568 }
 0x24b   : > { %612 = vadd.xlane.f32.xlu2 %v2483_v47  ;;  %618 = vadd.xlane.f32.xlu1 %v2480_v45 }
 0x24e   : > { %v571_v13 = vpop.xlane.xlu2 %570 }
 0x253   : > { %616 = vadd.xlane.f32.xlu2 %v2490_v56  ;;  %590 = vadd.xlane.f32.xlu1 %v2493_v58 }
 0x256   : > { %v573_v14 = vpop.xlane.xlu1 %572 }
 0x25b   : > { %727 = vadd.xlane.f32.xlu2 %v695_v4  ;;  %729 = vadd.xlane.f32.xlu1 %v696_v5  ;;  %v636_v4 = vmul.f32 %v2487_v52, %v571_v13  ;;  %v635_v13 = vmul.f32 %v2487_v52, %v569_v49 }
 0x25d   : > { %v2562_v51 = vsub.f32 %v2396_v57, %v636_v4  ;;  %v2574_v57 = vsub.f32 %v2392_v55, %v635_v13  ;;  %v637_v4 = vmul.f32 %v2487_v52, %v573_v14 }
 0x25e   : > { %v575_v17 = vpop.xlane.xlu2 %574 }
 0x25f   : > { %v700_v35 = vmul.f32 %v2562_v51, %v2562_v51  ;;  %v638_v49 = vmul.f32 %v2487_v52, %v575_v17 }
 0x261   : > { %v2586_v55 = vsub.f32 %v2404_v62, %v638_v49 }
 0x263   : > { %622 = vadd.xlane.f32.xlu1 %v2513_v11  ;;  %620 = vadd.xlane.f32.xlu2 %v2510_v10 }
 0x266   : > { %v2517_v18 = vpop.xlane.xlu1 %576 }
 0x267   : > { %v639_v49 = vmul.f32 %v2487_v52, %v2517_v18 }
 0x26e   : > { %v2519_v19 = vpop.xlane.xlu2 %578 }
 0x276   : > { %v2521_v23 = vpop.xlane.xlu1 %580 }
 0x27e   : > { %v2523_v24 = vpop.xlane.xlu2 %582 }
 0x27f   : > { %v642_v18 = vmul.f32 %v2487_v52, %v2523_v24 }
 0x286   : > { %v2525_v27 = vpop.xlane.xlu1 %584 }
 0x28e   : > { %v2527_v44 = vpop.xlane.xlu2 %586  ;;  %v595_v30 = vpop.xlane.xlu1 %594 }
 0x28f   : > { %v648_v31 = vmul.f32 %v2487_v52, %v595_v30 }
 0x291   : > { %v2531_v34 = vsub.f32 %v2428_v15, %v648_v31 }
 0x293   : > { %v712_v36 = vmul.f32 %v2531_v34, %v2531_v34 }
 0x295   : > { %761 = vadd.xlane.f32.xlu1 %v712_v36 }
 0x296   : > { %v593_v39 = vpop.xlane.xlu2 %592  ;;  %v599_v40 = vpop.xlane.xlu1 %598 }
 0x297   : > { %v647_v42 = vmul.f32 %v2487_v52, %v593_v39  ;;  %v650_v15 = vmul.f32 %v2487_v52, %v599_v40 }
 0x299   : > { %v2541_v48 = vsub.f32 %v2436_v20, %v647_v42  ;;  %v2553_v20 = vsub.f32 %v2439_v21, %v650_v15  ;;  %v699_v15 = vmul.f32 %v2574_v57, %v2574_v57 }
 0x29b   : > { %v711_v60 = vmul.f32 %v2541_v48, %v2541_v48  ;;  %v714_v7 = vmul.f32 %v2553_v20, %v2553_v20 }
 0x29d   : > { %733 = vadd.xlane.f32.xlu1 %v698_v54  ;;  %759 = vadd.xlane.f32.xlu2 %v711_v60 }
 0x29e   : > { %v597_v61 = vpop.xlane.xlu2 %596  ;;  %v603_v53 = vpop.xlane.xlu1 %602 }
 0x29f   : > { %v649_v5 = vmul.f32 %v2487_v52, %v597_v61  ;;  %v652_v31 = vmul.f32 %v2487_v52, %v603_v53  ;;  %v702_v61 = vmul.f32 %v2586_v55, %v2586_v55 }
 0x2a1   : > { %v2565_v21 = vsub.f32 %v2448_v25, %v649_v5  ;;  %v2577_v25 = vsub.f32 %v2451_v26, %v652_v31 }
 0x2a3   : > { %v713_v36 = vmul.f32 %v2565_v21, %v2565_v21  ;;  %v716_v50 = vmul.f32 %v2577_v25, %v2577_v25 }
 0x2a5   : > { %765 = vadd.xlane.f32.xlu1 %v714_v7  ;;  %731 = vadd.xlane.f32.xlu2 %v697_v8  ;;  %v2604_v8 = vsub.f32 %v2400_v59, %v637_v4 }
 0x2a6   : > { %v601_v46 = vpop.xlane.xlu2 %600  ;;  %v607_v30 = vpop.xlane.xlu1 %606 }
 0x2a7   : > { %v651_v42 = vmul.f32 %v2487_v52, %v601_v46  ;;  %v654_v17 = vmul.f32 %v2487_v52, %v607_v30  ;;  %v640_v30 = vmul.f32 %v2487_v52, %v2519_v19  ;;  %v701_v31 = vmul.f32 %v2604_v8, %v2604_v8 }
 0x2a9   : > { %v2589_v26 = vsub.f32 %v2456_v28, %v651_v42  ;;  %v2600_v62 = vsub.f32 %v2459_v29, %v654_v17  ;;  %v2623_v19 = vsub.f32 %v2412_v3, %v640_v30  ;;  %v2641_v17 = vsub.f32 %v2408_v0, %v639_v49 }
 0x2aa   : > { %v2651_v0 = vsub.f32 %v2420_v9, %v642_v18 }
 0x2ab   : > { %v715_v53 = vmul.f32 %v2589_v26, %v2589_v26  ;;  %v718_v13 = vmul.f32 %v2600_v62, %v2600_v62 }
 0x2ad   : > { %737 = vadd.xlane.f32.xlu1 %v700_v35  ;;  %763 = vadd.xlane.f32.xlu2 %v713_v36 }
 0x2ae   : > { %v605_v39 = vpop.xlane.xlu2 %604  ;;  %v611_v40 = vpop.xlane.xlu1 %610 }
 0x2af   : > { %v653_v29 = vmul.f32 %v2487_v52, %v605_v39  ;;  %v656_v36 = vmul.f32 %v2487_v52, %v611_v40  ;;  %v704_v39 = vmul.f32 %v2623_v19, %v2623_v19 }
 0x2b1   : > { %v2626_v35 = vsub.f32 %v2464_v32, %v653_v29  ;;  %v2636_v3 = vsub.f32 %v2467_v33, %v656_v36  ;;  %v703_v33 = vmul.f32 %v2641_v17, %v2641_v17 }
 0x2b3   : > { %v717_v42 = vmul.f32 %v2626_v35, %v2626_v35  ;;  %v720_v4 = vmul.f32 %v2636_v3, %v2636_v3 }
 0x2b5   : > { %769 = vadd.xlane.f32.xlu1 %v716_v50  ;;  %735 = vadd.xlane.f32.xlu2 %v699_v15 }
 0x2b6   : > { %v609_v54 = vpop.xlane.xlu2 %608  ;;  %v615_v60 = vpop.xlane.xlu1 %614 }
 0x2bd   : > { %741 = vadd.xlane.f32.xlu1 %v702_v61  ;;  %767 = vadd.xlane.f32.xlu2 %v715_v53 }
 0x2be   : > { %v2597_v5 = vpop.xlane.xlu2 %612  ;;  %v619_v7 = vpop.xlane.xlu1 %618 }
 0x2bf   : > { %v660_v28 = vmul.f32 %v2487_v52, %v619_v7  ;;  %v655_v7 = vmul.f32 %v2487_v52, %v609_v54  ;;  %v706_v54 = vmul.f32 %v2651_v0, %v2651_v0  ;;  %v657_v18 = vmul.f32 %v2487_v52, %v2597_v5  ;;  %v1241_v5 = vld [vmem:[%s2332_s12 + $0x8] sm:$0xff] }
 0x2c1   : > { %v2607_v46 = vsub.f32 %v2480_v45, %v660_v28  ;;  %v2654_v28 = vsub.f32 %v2472_v37, %v655_v7 }
 0x2c3   : > { %v724_v14 = vmul.f32 %v2607_v46, %v2607_v46  ;;  %v719_v9 = vmul.f32 %v2654_v28, %v2654_v28 }
 0x2c5   : > { %785 = vadd.xlane.f32.xlu0 %v724_v14  ;;  %773 = vadd.xlane.f32.xlu1 %v718_v13  ;;  %v658_v13 = vmul.f32 %v2487_v52, %v615_v60 }
 0x2c6   : > { %739 = vadd.xlane.f32.xlu2 %v701_v31  ;;  %v2618_v59 = vpop.xlane.xlu2 %616  ;;  %v2620_v45 = vpop.xlane.xlu1 %590  ;;  %v641_v31 = vmul.f32 %v2487_v52, %v2521_v23  ;;  %v2670_v23 = vperm.slane %v2369_v43, 1 }
 0x2c7   : > { %v2664_v49 = vsub.f32 %v2475_v38, %v658_v13 }
 0x2c8   : > { %v2667_v60 = vsub.f32 %v2416_v6, %v641_v31 }
 0x2c9   : > { %v722_v6 = vmul.f32 %v2664_v49, %v2664_v49 }
 0x2ca   : > { %v705_v43 = vmul.f32 %v2667_v60, %v2667_v60 }
 0x2cd   : > { %745 = vadd.xlane.f32.xlu1 %v704_v39 }
 0x2ce   : > { %771 = vadd.xlane.f32.xlu2 %v717_v42  ;;  %v728_v50 = vpop.xlane.xlu2 %727  ;;  %v730_v15 = vpop.xlane.xlu1 %729 }
 0x2cf   : > { %v791_v32 = vmul.f32 %v728_v50, %v2487_v52  ;;  %v792_v40 = vmul.f32 %v730_v15, %v2487_v52 }
 0x2d1   : > { %v823_v61 = vadd.f32 1e-05, %v791_v32  ;;  %v824_v53 = vadd.f32 1e-05, %v792_v40  ;;  %v644_v40 = vmul.f32 %v2487_v52, %v2527_v44  ;;  %v1240_v44 = vld [vmem:[%s2332_s12] sm:$0xff] }
 0x2d3   : > { %1711 = vrsqrt.f32 %v823_v61  ;;  %vm861_vm4 = vweird.f32 %v823_v61  ;;  %vm871_vm6 = vweird.f32 %v824_v53 }
 0x2d4   : > { %1713 = vrsqrt.f32 %v824_v53 }
 0x2d5   : > { %777 = vadd.xlane.f32.xlu1 %v720_v4 }
 0x2d6   : > { %743 = vadd.xlane.f32.xlu2 %v703_v33  ;;  %v621_v31 = vpop.xlane.xlu2 %620 }
 0x2d9   : > { %v1712_v30 = vpop.eup %1711 }
 0x2da   : > { %v1714_v24 = vpop.eup %1713  ;;  %v856_v14 = vmul.f32 %v1712_v30, %v823_v61  ;;  %vm862_vm2 = vweird.f32 %v1712_v30 }
 0x2db   : > { %v866_v29 = vmul.f32 %v1714_v24, %v824_v53  ;;  %vm872_vm3 = vweird.f32 %v1714_v24  ;;  %vm863_vm5 = vmor %vm861_vm4, %vm862_vm2  ;;  %v2685_v53 = vsub.f32 %v2431_v16, %v644_v40 }
 0x2dc   : > { %v857_v36 = vmul.f32 %v1712_v30, %v856_v14  ;;  %vm873_vm7 = vmor %vm871_vm6, %vm872_vm3 }
 0x2dd   : > { %v867_v39 = vmul.f32 %v1714_v24, %v866_v29  ;;  %749 = vadd.xlane.f32.xlu1 %v706_v54  ;;  %v708_v16 = vmul.f32 %v2685_v53, %v2685_v53 }
 0x2de   : > { %v858_v37 = vmul.f32 0.5, %v857_v36  ;;  %775 = vadd.xlane.f32.xlu2 %v719_v9  ;;  %v661_v36 = vmul.f32 %v2487_v52, %v621_v31 }
 0x2df   : > { %v868_v42 = vmul.f32 0.5, %v867_v39 }
 0x2e0   : > { %v859_v50 = vsub.f32 1.5, %v858_v37  ;;  %v589_v37 = vpop.xlane.xlu0 %588 }
 0x2e1   : > { %v869_v15 = vsub.f32 1.5, %v868_v42 }
 0x2e2   : > { %v860_v32 = vmul.f32 %v1712_v30, %v859_v50  ;;  %v645_v50 = vmul.f32 %v2487_v52, %v589_v37 }
 0x2e3   : > { %v870_v38 = vmul.f32 %v1714_v24, %v869_v15 }
 0x2e4   : > { %v864_v4 = vsel %vm863_vm5, %v1712_v30, %v860_v32  ;;  %v2690_v30 = vsub.f32 %v2483_v47, %v657_v18  ;;  %v2730_v15 = vsub.f32 %v2442_v22, %v645_v50  ;;  %v623_v32 = vpop.xlane.xlu1 %622 }
 0x2e5   : > { %v1175_v61 = vmul.f32 %v864_v4, %v2500_v1  ;;  %v874_v7 = vsel %vm873_vm7, %v1714_v24, %v870_v38  ;;  %781 = vadd.xlane.f32.xlu1 %v722_v6  ;;  %v646_v1 = vmul.f32 %v2487_v52, %v2620_v45 }
 0x2e6   : > { %v1176_v33 = vmul.f32 %v874_v7, %v2503_v2  ;;  %747 = vadd.xlane.f32.xlu2 %v705_v43  ;;  %v643_v2 = vmul.f32 %v2487_v52, %v2525_v27  ;;  %v721_v47 = vmul.f32 %v2690_v30, %v2690_v30  ;;  %v659_v27 = vmul.f32 %v2487_v52, %v2618_v59 }
 0x2e7   : > { %v1208_v14 = vmul.f32 %v2670_v23, %v1175_v61  ;;  %v2706_v24 = vsub.f32 %v2493_v58, %v646_v1  ;;  %v2719_v58 = vsub.f32 %v2510_v10, %v661_v36  ;;  %v662_v10 = vmul.f32 %v2487_v52, %v623_v32 }
 0x2e8   : > { %v1209_v13 = vmul.f32 %v2670_v23, %v1176_v33  ;;  %v2709_v45 = vsub.f32 %v2424_v12, %v643_v2  ;;  %v2722_v12 = vsub.f32 %v2490_v56, %v659_v27  ;;  %v709_v56 = vmul.f32 %v2730_v15, %v2730_v15 }
 0x2e9   : > { %v1272_v29 = vadd.f32 %v1240_v44, %v1208_v14  ;;  %v710_v9 = vmul.f32 %v2706_v24, %v2706_v24  ;;  %v725_v42 = vmul.f32 %v2719_v58, %v2719_v58  ;;  %v2736_v40 = vsub.f32 %v2513_v11, %v662_v10  ;;  %v1257_v10 = vld [vmem:[%s2332_s12 + $0x88] sm:$0xff] }
 0x2ea   : > { %v1273_v54 = vadd.f32 %v1241_v5, %v1209_v13  ;;  %v707_v39 = vmul.f32 %v2709_v45, %v2709_v45  ;;  %v723_v59 = vmul.f32 %v2722_v12, %v2722_v12 }
 0x2eb   : > { %1304 = vst [vmem:[%s2695_s7] sm:$0xff] %v1272_v29  ;;  %v726_v4 = vmul.f32 %v2736_v40, %v2736_v40 }
 0x2ec   : > { %1305 = vst [vmem:[%s2695_s7 + $0x8] sm:$0xff] %v1273_v54 }
 0x2ed   : > { %753 = vadd.xlane.f32.xlu1 %v708_v16 }
 0x2ee   : > { %779 = vadd.xlane.f32.xlu2 %v721_v47 }
 0x2f5   : > { %757 = vadd.xlane.f32.xlu1 %v710_v9 }
 0x2f6   : > { %751 = vadd.xlane.f32.xlu2 %v707_v39 }
 0x2fd   : > { %787 = vadd.xlane.f32.xlu1 %v725_v42 }
 0x2fe   : > { %783 = vadd.xlane.f32.xlu2 %v723_v59 }
 0x306   : > { %755 = vadd.xlane.f32.xlu2 %v709_v56 }
 0x308   : > { %v762_v38 = vpop.xlane.xlu1 %761 }
 0x309   : > { %v808_v6 = vmul.f32 %v762_v38, %v2487_v52 }
 0x30b   : > { %v840_v18 = vadd.f32 1e-05, %v808_v6 }
 0x30d   : > { %1715 = vrsqrt.f32 %v840_v18  ;;  %vm1031_vm9 = vweird.f32 %v840_v18 }
 0x30e   : > { %789 = vadd.xlane.f32.xlu2 %v726_v4 }
 0x310   : > { %v734_v22 = vpop.xlane.xlu1 %733  ;;  %v760_v43 = vpop.xlane.xlu2 %759 }
 0x311   : > { %v794_v61 = vmul.f32 %v734_v22, %v2487_v52  ;;  %v807_v7 = vmul.f32 %v760_v43, %v2487_v52 }
 0x313   : > { %v1716_v44 = vpop.eup %1715  ;;  %v826_v33 = vadd.f32 1e-05, %v794_v61  ;;  %v839_v14 = vadd.f32 1e-05, %v807_v7 }
 0x314   : > { %v1026_v11 = vmul.f32 %v1716_v44, %v840_v18  ;;  %vm1032_vm8 = vweird.f32 %v1716_v44 }
 0x315   : > { %1717 = vrsqrt.f32 %v826_v33  ;;  %vm1033_vm10 = vmor %vm1031_vm9, %vm1032_vm8  ;;  %vm891_vm13 = vweird.f32 %v826_v33  ;;  %vm1021_vm15 = vweird.f32 %v839_v14 }
 0x316   : > { %v1027_v5 = vmul.f32 %v1716_v44, %v1026_v11  ;;  %1719 = vrsqrt.f32 %v839_v14 }
 0x318   : > { %v1028_v13 = vmul.f32 0.5, %v1027_v5  ;;  %v766_v29 = vpop.xlane.xlu1 %765  ;;  %v732_v54 = vpop.xlane.xlu2 %731 }
 0x319   : > { %v810_v1 = vmul.f32 %v766_v29, %v2487_v52  ;;  %v793_v16 = vmul.f32 %v732_v54, %v2487_v52 }
 0x31a   : > { %v1029_v2 = vsub.f32 1.5, %v1028_v13 }
 0x31b   : > { %v1718_v47 = vpop.eup %1717  ;;  %v2745_v31 = vadd.f32 1e-05, %v810_v1  ;;  %v2747_v36 = vadd.f32 1e-05, %v793_v16 }
 0x31c   : > { %v1720_v9 = vpop.eup %1719  ;;  %v1030_v27 = vmul.f32 %v1716_v44, %v1029_v2  ;;  %v886_v39 = vmul.f32 %v1718_v47, %v826_v33  ;;  %vm892_vm11 = vweird.f32 %v1718_v47 }
 0x31d   : > { %v1016_v37 = vmul.f32 %v1720_v9, %v839_v14  ;;  %1721 = vrsqrt.f32 %v2745_v31  ;;  %vm1022_vm12 = vweird.f32 %v1720_v9  ;;  %vm893_vm14 = vmor %vm891_vm13, %vm892_vm11  ;;  %vm1051_vm3 = vweird.f32 %v2745_v31 }
 0x31e   : > { %v1034_v42 = vsel %vm1033_vm10, %v1716_v44, %v1030_v27  ;;  %v887_v50 = vmul.f32 %v1718_v47, %v886_v39  ;;  %1723 = vrsqrt.f32 %v2747_v36  ;;  %vm1023_vm0 = vmor %vm1021_vm15, %vm1022_vm12  ;;  %vm881_vm5 = vweird.f32 %v2747_v36 }
 0x31f   : > { %v1192_v59 = vmul.f32 %v1034_v42, %v2531_v34  ;;  %v1017_v32 = vmul.f32 %v1720_v9, %v1016_v37  ;;  %v1243_v42 = vld [vmem:[%s2332_s12 + $0x18] sm:$0xff] }
 0x320   : > { %v888_v56 = vmul.f32 0.5, %v887_v50  ;;  %v738_v38 = vpop.xlane.xlu1 %737  ;;  %v764_v6 = vpop.xlane.xlu2 %763 }
 0x321   : > { %v1225_v4 = vmul.f32 %v2670_v23, %v1192_v59  ;;  %v1018_v18 = vmul.f32 0.5, %v1017_v32  ;;  %v796_v22 = vmul.f32 %v738_v38, %v2487_v52  ;;  %v809_v43 = vmul.f32 %v764_v6, %v2487_v52 }
 0x322   : > { %v889_v61 = vsub.f32 1.5, %v888_v56  ;;  %v1256_v56 = vld [vmem:[%s2332_s12 + $0x80] sm:$0xff] }
 0x323   : > { %v1722_v7 = vpop.eup %1721  ;;  %v1289_v44 = vadd.f32 %v1257_v10, %v1225_v4  ;;  %v1019_v11 = vsub.f32 1.5, %v1018_v18  ;;  %v2756_v34 = vadd.f32 1e-05, %v796_v22  ;;  %v2758_v5 = vadd.f32 1e-05, %v809_v43 }
 0x324   : > { %v1724_v13 = vpop.eup %1723  ;;  %v890_v29 = vmul.f32 %v1718_v47, %v889_v61  ;;  %v1046_v54 = vmul.f32 %v1722_v7, %v2745_v31  ;;  %vm1052_vm1 = vweird.f32 %v1722_v7 }
 0x325   : > { %1321 = vst [vmem:[%s2695_s7 + $0x88] sm:$0xff] %v1289_v44  ;;  %v1020_v1 = vmul.f32 %v1720_v9, %v1019_v11  ;;  %v876_v16 = vmul.f32 %v1724_v13, %v2747_v36  ;;  %1725 = vrsqrt.f32 %v2756_v34  ;;  %vm882_vm2 = vweird.f32 %v1724_v13  ;;  %vm1053_vm4 = vmor %vm1051_vm3, %vm1052_vm1 }
 0x326   : > { %v894_v2 = vsel %vm893_vm14, %v1718_v47, %v890_v29  ;;  %v1047_v27 = vmul.f32 %v1722_v7, %v1046_v54  ;;  %1727 = vrsqrt.f32 %v2758_v5  ;;  %vm883_vm6 = vmor %vm881_vm5, %vm882_vm2  ;;  %vm911_vm9 = vweird.f32 %v2756_v34 }
 0x327   : > { %v1178_v39 = vmul.f32 %v894_v2, %v2537_v41  ;;  %v1024_v33 = vsel %vm1023_vm0, %v1720_v9, %v1020_v1  ;;  %v877_v37 = vmul.f32 %v1724_v13, %v876_v16  ;;  %vm1041_vm11 = vweird.f32 %v2758_v5 }
 0x328   : > { %v1191_v50 = vmul.f32 %v1024_v33, %v2541_v48  ;;  %v1048_v59 = vmul.f32 0.5, %v1047_v27  ;;  %v770_v14 = vpop.xlane.xlu1 %769  ;;  %v736_v32 = vpop.xlane.xlu2 %735  ;;  %v1259_v33 = vld [vmem:[%s2332_s12 + $0x98] sm:$0xff] }
 0x329   : > { %v1211_v10 = vmul.f32 %v2670_v23, %v1178_v39  ;;  %v878_v38 = vmul.f32 0.5, %v877_v37  ;;  %v812_v47 = vmul.f32 %v770_v14, %v2487_v52  ;;  %v795_v6 = vmul.f32 %v736_v32, %v2487_v52  ;;  %v1242_v14 = vld [vmem:[%s2332_s12 + $0x10] sm:$0xff] }
 0x32a   : > { %v1224_v4 = vmul.f32 %v2670_v23, %v1191_v50  ;;  %v1049_v41 = vsub.f32 1.5, %v1048_v59 }
 0x32b   : > { %v1726_v9 = vpop.eup %1725  ;;  %v1275_v48 = vadd.f32 %v1243_v42, %v1211_v10  ;;  %v879_v18 = vsub.f32 1.5, %v878_v38  ;;  %v2774_v22 = vadd.f32 1e-05, %v812_v47  ;;  %v2776_v43 = vadd.f32 1e-05, %v795_v6 }
 0x32c   : > { %v1728_v61 = vpop.eup %1727  ;;  %v1288_v44 = vadd.f32 %v1256_v56, %v1224_v4  ;;  %v1050_v11 = vmul.f32 %v1722_v7, %v1049_v41  ;;  %v906_v29 = vmul.f32 %v1726_v9, %v2756_v34  ;;  %vm912_vm7 = vweird.f32 %v1726_v9 }
 0x32d   : > { %1307 = vst [vmem:[%s2695_s7 + $0x18] sm:$0xff] %v1275_v48  ;;  %v880_v54 = vmul.f32 %v1724_v13, %v879_v18  ;;  %v1036_v1 = vmul.f32 %v1728_v61, %v2758_v5  ;;  %1729 = vrsqrt.f32 %v2774_v22  ;;  %vm1042_vm8 = vweird.f32 %v1728_v61  ;;  %vm913_vm10 = vmor %vm911_vm9, %vm912_vm7 }
 0x32e   : > { %1320 = vst [vmem:[%s2695_s7 + $0x80] sm:$0xff] %v1288_v44  ;;  %v1054_v16 = vsel %vm1053_vm4, %v1722_v7, %v1050_v11  ;;  %v907_v2 = vmul.f32 %v1726_v9, %v906_v29  ;;  %1731 = vrsqrt.f32 %v2776_v43  ;;  %vm1043_vm12 = vmor %vm1041_vm11, %vm1042_vm8  ;;  %vm1071_vm15 = vweird.f32 %v2774_v22 }
 0x32f   : > { %v1194_v31 = vmul.f32 %v1054_v16, %v2553_v20  ;;  %v884_v27 = vsel %vm883_vm6, %v1724_v13, %v880_v54  ;;  %v1037_v39 = vmul.f32 %v1728_v61, %v1036_v1  ;;  %vm901_vm1 = vweird.f32 %v2776_v43 }
 0x330   : > { %v1177_v37 = vmul.f32 %v884_v27, %v2550_v63  ;;  %v908_v36 = vmul.f32 0.5, %v907_v2  ;;  %v742_v42 = vpop.xlane.xlu1 %741  ;;  %v768_v50 = vpop.xlane.xlu2 %767  ;;  %v1245_v2 = vld [vmem:[%s2332_s12 + $0x28] sm:$0xff] }
 0x331   : > { %v1227_v59 = vmul.f32 %v2670_v23, %v1194_v31  ;;  %v1038_v32 = vmul.f32 0.5, %v1037_v39  ;;  %v798_v7 = vmul.f32 %v742_v42, %v2487_v52  ;;  %v811_v10 = vmul.f32 %v768_v50, %v2487_v52 }
 0x332   : > { %v1210_v56 = vmul.f32 %v2670_v23, %v1177_v37  ;;  %v909_v20 = vsub.f32 1.5, %v908_v36  ;;  %v1258_v37 = vld [vmem:[%s2332_s12 + $0x90] sm:$0xff] }
 0x333   : > { %v1730_v13 = vpop.eup %1729  ;;  %v1291_v63 = vadd.f32 %v1259_v33, %v1227_v59  ;;  %v1039_v38 = vsub.f32 1.5, %v1038_v32  ;;  %v2795_v47 = vadd.f32 1e-05, %v798_v7  ;;  %v2797_v6 = vadd.f32 1e-05, %v811_v10 }
 0x334   : > { %v1732_v4 = vpop.eup %1731  ;;  %v1274_v41 = vadd.f32 %v1242_v14, %v1210_v56  ;;  %v910_v48 = vmul.f32 %v1726_v9, %v909_v20  ;;  %v1066_v18 = vmul.f32 %v1730_v13, %v2774_v22  ;;  %vm1072_vm13 = vweird.f32 %v1730_v13 }
 0x335   : > { %1323 = vst [vmem:[%s2695_s7 + $0x98] sm:$0xff] %v1291_v63  ;;  %v1040_v44 = vmul.f32 %v1728_v61, %v1039_v38  ;;  %v896_v11 = vmul.f32 %v1732_v4, %v2776_v43  ;;  %1733 = vrsqrt.f32 %v2795_v47  ;;  %vm902_vm14 = vweird.f32 %v1732_v4  ;;  %vm1073_vm0 = vmor %vm1071_vm15, %vm1072_vm13 }
 0x336   : > { %1306 = vst [vmem:[%s2695_s7 + $0x10] sm:$0xff] %v1274_v41  ;;  %v914_v29 = vsel %vm913_vm10, %v1726_v9, %v910_v48  ;;  %v1067_v54 = vmul.f32 %v1730_v13, %v1066_v18  ;;  %1735 = vrsqrt.f32 %v2797_v6  ;;  %vm903_vm2 = vmor %vm901_vm1, %vm902_vm14  ;;  %vm931_vm5 = vweird.f32 %v2795_v47 }
 0x337   : > { %v1180_v34 = vmul.f32 %v914_v29, %v2562_v51  ;;  %v1044_v1 = vsel %vm1043_vm12, %v1728_v61, %v1040_v44  ;;  %v897_v16 = vmul.f32 %v1732_v4, %v896_v11  ;;  %vm1061_vm7 = vweird.f32 %v2797_v6 }
 0x338   : > { %v1193_v31 = vmul.f32 %v1044_v1, %v2565_v21  ;;  %v1068_v5 = vmul.f32 0.5, %v1067_v54  ;;  %v774_v27 = vpop.xlane.xlu1 %773  ;;  %v786_v39 = vpop.xlane.xlu0 %785 }
 0x339   : > { %v1213_v33 = vmul.f32 %v2670_v23, %v1180_v34  ;;  %v898_v9 = vmul.f32 0.5, %v897_v16  ;;  %v814_v36 = vmul.f32 %v774_v27, %v2487_v52  ;;  %v740_v42 = vpop.xlane.xlu2 %739  ;;  %v820_v50 = vmul.f32 %v786_v39, %v2487_v52  ;;  %v1261_v34 = vld [vmem:[%s2332_s12 + $0xa8] sm:$0xff] }
 0x33a   : > { %v1226_v51 = vmul.f32 %v2670_v23, %v1193_v31  ;;  %v1069_v61 = vsub.f32 1.5, %v1068_v5  ;;  %v797_v21 = vmul.f32 %v740_v42, %v2487_v52 }
 0x33b   : > { %v1734_v59 = vpop.eup %1733  ;;  %v1277_v14 = vadd.f32 %v1245_v2, %v1213_v33  ;;  %v899_v32 = vsub.f32 1.5, %v898_v9  ;;  %v2817_v7 = vadd.f32 1e-05, %v814_v36  ;;  %v2819_v10 = vadd.f32 1e-05, %v820_v50  ;;  %v1244_v2 = vld [vmem:[%s2332_s12 + $0x20] sm:$0xff] }
 0x33c   : > { %v1736_v56 = vpop.eup %1735  ;;  %v1290_v20 = vadd.f32 %v1258_v37, %v1226_v51  ;;  %v1070_v63 = vmul.f32 %v1730_v13, %v1069_v61  ;;  %v926_v38 = vmul.f32 %v1734_v59, %v2795_v47  ;;  %v2830_v22 = vadd.f32 1e-05, %v797_v21 }
 0x33d   : > { %1309 = vst [vmem:[%s2695_s7 + $0x28] sm:$0xff] %v1277_v14  ;;  %v900_v41 = vmul.f32 %v1732_v4, %v899_v32  ;;  %v1056_v48 = vmul.f32 %v1736_v56, %v2797_v6  ;;  %1737 = vrsqrt.f32 %v2817_v7  ;;  %vm932_vm3 = vweird.f32 %v1734_v59 }
 0x33e   : > { %1322 = vst [vmem:[%s2695_s7 + $0x90] sm:$0xff] %v1290_v20  ;;  %v1074_v18 = vsel %vm1073_vm0, %v1730_v13, %v1070_v63  ;;  %v927_v44 = vmul.f32 %v1734_v59, %v926_v38  ;;  %1739 = vrsqrt.f32 %v2819_v10  ;;  %vm1062_vm4 = vweird.f32 %v1736_v56  ;;  %vm933_vm6 = vmor %vm931_vm5, %vm932_vm3 }
 0x33f   : > { %v1196_v11 = vmul.f32 %v1074_v18, %v2577_v25  ;;  %v904_v29 = vsel %vm903_vm2, %v1732_v4, %v900_v41  ;;  %v1057_v54 = vmul.f32 %v1736_v56, %v1056_v48  ;;  %1741 = vrsqrt.f32 %v2830_v22  ;;  %vm1063_vm8 = vmor %vm1061_vm7, %vm1062_vm4  ;;  %v1247_v41 = vld [vmem:[%s2332_s12 + $0x38] sm:$0xff] }
 0x340   : > { %v1179_v43 = vmul.f32 %v904_v29, %v2574_v57  ;;  %v928_v1 = vmul.f32 0.5, %v927_v44  ;;  %v746_v16 = vpop.xlane.xlu1 %745  ;;  %vm1091_vm9 = vweird.f32 %v2817_v7  ;;  %v1260_v29 = vld [vmem:[%s2332_s12 + $0xa0] sm:$0xff]  ;;  %vm1151_vm14 = vweird.f32 %v2819_v10 }
 0x341   : > { %v1229_v13 = vmul.f32 %v2670_v23, %v1196_v11  ;;  %v1058_v31 = vmul.f32 0.5, %v1057_v54  ;;  %v800_v5 = vmul.f32 %v746_v16, %v2487_v52  ;;  %v772_v27 = vpop.xlane.xlu2 %771  ;;  %vm921_vm15 = vweird.f32 %v2830_v22 }
 0x342   : > { %v1212_v25 = vmul.f32 %v2670_v23, %v1179_v43  ;;  %v929_v4 = vsub.f32 1.5, %v928_v1  ;;  %v813_v39 = vmul.f32 %v772_v27, %v2487_v52 }
 0x343   : > { %v2842_v33 = vpop.eup %1737  ;;  %v1293_v57 = vadd.f32 %v1261_v34, %v1229_v13  ;;  %v1059_v37 = vsub.f32 1.5, %v1058_v31  ;;  %v2844_v9 = vadd.f32 1e-05, %v800_v5 }
 0x344   : > { %v1276_v36 = vadd.f32 %v1244_v2, %v1212_v25  ;;  %v930_v42 = vmul.f32 %v1734_v59, %v929_v4  ;;  %v1086_v50 = vmul.f32 %v2842_v33, %v2817_v7  ;;  %v2849_v51 = vpop.eup %1739  ;;  %v2854_v21 = vadd.f32 1e-05, %v813_v39 }
 0x345   : > { %1325 = vst [vmem:[%s2695_s7 + $0xa8] sm:$0xff] %v1293_v57  ;;  %v1060_v61 = vmul.f32 %v1736_v56, %v1059_v37  ;;  %1743 = vrsqrt.f32 %v2844_v9  ;;  %v2856_v14 = vpop.eup %1741  ;;  %v1146_v20 = vmul.f32 %v2849_v51, %v2819_v10  ;;  %vm1092_vm10 = vweird.f32 %v2842_v33 }
 0x346   : > { %1308 = vst [vmem:[%s2695_s7 + $0x20] sm:$0xff] %v1276_v36  ;;  %v934_v47 = vsel %vm933_vm6, %v1734_v59, %v930_v42  ;;  %v1087_v32 = vmul.f32 %v2842_v33, %v1086_v50  ;;  %v916_v6 = vmul.f32 %v2856_v14, %v2830_v22  ;;  %1745 = vrsqrt.f32 %v2854_v21  ;;  %vm1093_vm12 = vmor %vm1091_vm9, %vm1092_vm10 }
 0x347   : > { %v1182_v63 = vmul.f32 %v934_v47, %v2586_v55  ;;  %v1064_v38 = vsel %vm1063_vm8, %v1736_v56, %v1060_v61  ;;  %v1147_v59 = vmul.f32 %v2849_v51, %v1146_v20  ;;  %vm1152_vm11 = vweird.f32 %v2849_v51 }
 0x348   : > { %v1195_v48 = vmul.f32 %v1064_v38, %v2589_v26  ;;  %v1088_v18 = vmul.f32 0.5, %v1087_v32  ;;  %v778_v44 = vpop.xlane.xlu1 %777  ;;  %v917_v55 = vmul.f32 %v2856_v14, %v916_v6  ;;  %vm922_vm13 = vweird.f32 %v2856_v14  ;;  %vm1153_vm0 = vmor %vm1151_vm14, %vm1152_vm11 }
 0x349   : > { %v1215_v11 = vmul.f32 %v2670_v23, %v1182_v63  ;;  %v816_v56 = vmul.f32 %v778_v44, %v2487_v52  ;;  %v744_v54 = vpop.xlane.xlu2 %743  ;;  %v1148_v43 = vmul.f32 0.5, %v1147_v59  ;;  %vm923_vm1 = vmor %vm921_vm15, %vm922_vm13  ;;  %vm951_vm3 = vweird.f32 %v2844_v9 }
 0x34a   : > { %v1228_v34 = vmul.f32 %v2670_v23, %v1195_v48  ;;  %v1089_v26 = vsub.f32 1.5, %v1088_v18  ;;  %v799_v1 = vmul.f32 %v744_v54, %v2487_v52  ;;  %v918_v2 = vmul.f32 0.5, %v917_v55 }
 0x34b   : > { %v2878_v16 = vpop.eup %1743  ;;  %v1279_v13 = vadd.f32 %v1247_v41, %v1215_v11  ;;  %v2881_v31 = vadd.f32 1e-05, %v816_v56  ;;  %v1149_v25 = vsub.f32 1.5, %v1148_v43  ;;  %vm1081_vm6 = vweird.f32 %v2854_v21 }
 0x34c   : > { %v1292_v5 = vadd.f32 %v1260_v29, %v1228_v34  ;;  %v1090_v27 = vmul.f32 %v2842_v33, %v1089_v26  ;;  %v946_v4 = vmul.f32 %v2878_v16, %v2844_v9  ;;  %v919_v39 = vsub.f32 1.5, %v918_v2  ;;  %v2894_v57 = vpop.eup %1745  ;;  %v1246_v29 = vld [vmem:[%s2332_s12 + $0x30] sm:$0xff] }
 0x34d   : > { %1311 = vst [vmem:[%s2695_s7 + $0x38] sm:$0xff] %v1279_v13  ;;  %1747 = vrsqrt.f32 %v2881_v31  ;;  %v1150_v36 = vmul.f32 %v2849_v51, %v1149_v25  ;;  %v2900_v50 = vadd.f32 1e-05, %v799_v1  ;;  %v1076_v10 = vmul.f32 %v2894_v57, %v2854_v21 }
 0x34e   : > { %1324 = vst [vmem:[%s2695_s7 + $0xa0] sm:$0xff] %v1292_v5  ;;  %v1094_v37 = vsel %vm1093_vm12, %v2842_v33, %v1090_v27  ;;  %v947_v42 = vmul.f32 %v2878_v16, %v946_v4  ;;  %v920_v61 = vmul.f32 %v2856_v14, %v919_v39  ;;  %v1263_v33 = vld [vmem:[%s2332_s12 + $0xb8] sm:$0xff]  ;;  %vm952_vm2 = vweird.f32 %v2878_v16  ;;  %v1249_v4 = vld [vmem:[%s2332_s12 + $0x48] sm:$0xff] }
 0x34f   : > { %v1198_v7 = vmul.f32 %v1094_v37, %v2600_v62  ;;  %v1154_v47 = vsel %vm1153_vm0, %v2849_v51, %v1150_v36  ;;  %1749 = vrsqrt.f32 %v2900_v50  ;;  %v1077_v38 = vmul.f32 %v2894_v57, %v1076_v10  ;;  %v1269_v51 = vld [vmem:[%s2332_s12 + $0xe8] sm:$0xff]  ;;  %vm953_vm5 = vmor %vm951_vm3, %vm952_vm2 }
 0x350   : > { %v948_v32 = vmul.f32 0.5, %v947_v42  ;;  %v750_v62 = vpop.xlane.xlu1 %749  ;;  %v924_v20 = vsel %vm923_vm1, %v2856_v14, %v920_v61  ;;  %v1204_v63 = vmul.f32 %v1154_v47, %v2607_v46  ;;  %vm1082_vm4 = vweird.f32 %v2894_v57  ;;  %v1262_v47 = vld [vmem:[%s2332_s12 + $0xb0] sm:$0xff] }
 0x351   : > { %v1231_v22 = vmul.f32 %v2670_v23, %v1198_v7  ;;  %v776_v6 = vpop.xlane.xlu2 %775  ;;  %v1181_v41 = vmul.f32 %v924_v20, %v2604_v8  ;;  %v802_v18 = vmul.f32 %v750_v62, %v2487_v52  ;;  %v1078_v46 = vmul.f32 0.5, %v1077_v38  ;;  %vm1083_vm7 = vmor %vm1081_vm6, %vm1082_vm4 }
 0x352   : > { %v949_v48 = vsub.f32 1.5, %v948_v32  ;;  %v815_v59 = vmul.f32 %v776_v6, %v2487_v52  ;;  %v1237_v55 = vmul.f32 %v2670_v23, %v1204_v63  ;;  %vm1111_vm9 = vweird.f32 %v2881_v31 }
 0x353   : > { %v1748_v44 = vpop.eup %1747  ;;  %v1295_v11 = vadd.f32 %v1263_v33, %v1231_v22  ;;  %v1214_v14 = vmul.f32 %v2670_v23, %v1181_v41  ;;  %v1079_v34 = vsub.f32 1.5, %v1078_v46  ;;  %v2933_v26 = vadd.f32 1e-05, %v802_v18  ;;  %v1265_v18 = vld [vmem:[%s2332_s12 + $0xc8] sm:$0xff] }
 0x354   : > { %v950_v56 = vmul.f32 %v2878_v16, %v949_v48  ;;  %v1106_v8 = vmul.f32 %v1748_v44, %v2881_v31  ;;  %v1301_v54 = vadd.f32 %v1269_v51, %v1237_v55  ;;  %v2935_v9 = vadd.f32 1e-05, %v815_v59 }
 0x355   : > { %1327 = vst [vmem:[%s2695_s7 + $0xb8] sm:$0xff] %v1295_v11  ;;  %v1750_v43 = vpop.eup %1749  ;;  %v1278_v1 = vadd.f32 %v1246_v29, %v1214_v14  ;;  %v1080_v27 = vmul.f32 %v2894_v57, %v1079_v34  ;;  %vm1112_vm8 = vweird.f32 %v1748_v44  ;;  %1751 = vrsqrt.f32 %v2933_v26 }
 0x356   : > { %v954_v13 = vsel %vm953_vm5, %v2878_v16, %v950_v56  ;;  %v1107_v2 = vmul.f32 %v1748_v44, %v1106_v8  ;;  %1333 = vst [vmem:[%s2695_s7 + $0xe8] sm:$0xff] %v1301_v54  ;;  %v936_v25 = vmul.f32 %v1750_v43, %v2900_v50  ;;  %1753 = vrsqrt.f32 %v2935_v9  ;;  %vm1113_vm10 = vmor %vm1111_vm9, %vm1112_vm8  ;;  %v1248_v54 = vld [vmem:[%s2332_s12 + $0x40] sm:$0xff] }
 0x357   : > { %v1184_v5 = vmul.f32 %v954_v13, %v2623_v19  ;;  %1310 = vst [vmem:[%s2695_s7 + $0x30] sm:$0xff] %v1278_v1  ;;  %v1084_v19 = vsel %vm1083_vm7, %v2894_v57, %v1080_v27  ;;  %vm942_vm11 = vweird.f32 %v1750_v43  ;;  %vm941_vm12 = vweird.f32 %v2900_v50 }
 0x358   : > { %v1108_v39 = vmul.f32 0.5, %v1107_v2  ;;  %v782_v16 = vpop.xlane.xlu1 %781  ;;  %v937_v36 = vmul.f32 %v1750_v43, %v936_v25  ;;  %v1197_v42 = vmul.f32 %v1084_v19, %v2626_v35  ;;  %vm943_vm13 = vmor %vm941_vm12, %vm942_vm11  ;;  %vm971_vm0 = vweird.f32 %v2933_v26 }
 0x359   : > { %v1217_v37 = vmul.f32 %v2670_v23, %v1184_v5  ;;  %v748_v21 = vpop.xlane.xlu2 %747  ;;  %v818_v61 = vmul.f32 %v782_v16, %v2487_v52  ;;  %vm1101_vm2 = vweird.f32 %v2935_v9 }
 0x35a   : > { %v1109_v7 = vsub.f32 1.5, %v1108_v39  ;;  %v801_v10 = vmul.f32 %v748_v21, %v2487_v52  ;;  %v938_v32 = vmul.f32 0.5, %v937_v36  ;;  %v1230_v62 = vmul.f32 %v2670_v23, %v1197_v42 }
 0x35b   : > { %v1281_v33 = vadd.f32 %v1249_v4, %v1217_v37  ;;  %v2957_v22 = vadd.f32 1e-05, %v818_v61  ;;  %v1752_v63 = vpop.eup %1751 }
 0x35c   : > { %v1110_v57 = vmul.f32 %v1748_v44, %v1109_v7  ;;  %v2959_v20 = vadd.f32 1e-05, %v801_v10  ;;  %v939_v35 = vsub.f32 1.5, %v938_v32  ;;  %v1294_v38 = vadd.f32 %v1262_v47, %v1230_v62  ;;  %v1754_v31 = vpop.eup %1753 }
 0x35d   : > { %1313 = vst [vmem:[%s2695_s7 + $0x48] sm:$0xff] %v1281_v33  ;;  %1755 = vrsqrt.f32 %v2957_v22  ;;  %v966_v48 = vmul.f32 %v1752_v63, %v2933_v26  ;;  %v1096_v59 = vmul.f32 %v1754_v31, %v2935_v9  ;;  %vm972_vm14 = vweird.f32 %v1752_v63  ;;  %v1251_v9 = vld [vmem:[%s2332_s12 + $0x58] sm:$0xff] }
 0x35e   : > { %v1114_v6 = vsel %vm1113_vm10, %v1748_v44, %v1110_v57  ;;  %v940_v51 = vmul.f32 %v1750_v43, %v939_v35  ;;  %1326 = vst [vmem:[%s2695_s7 + $0xb0] sm:$0xff] %v1294_v38  ;;  %1757 = vrsqrt.f32 %v2959_v20  ;;  %vm1102_vm15 = vweird.f32 %v1754_v31  ;;  %vm973_vm1 = vmor %vm971_vm0, %vm972_vm14 }
 0x35f   : > { %v1200_v41 = vmul.f32 %v1114_v6, %v2636_v3  ;;  %v967_v55 = vmul.f32 %v1752_v63, %v966_v48  ;;  %v1097_v14 = vmul.f32 %v1754_v31, %v1096_v59  ;;  %vm1131_vm3 = vweird.f32 %v2957_v22  ;;  %vm1103_vm4 = vmor %vm1101_vm2, %vm1102_vm15 }
 0x360   : > { %v754_v11 = vpop.xlane.xlu1 %753  ;;  %v944_v29 = vsel %vm943_vm13, %v1750_v43, %v940_v51  ;;  %v1264_v51 = vld [vmem:[%s2332_s12 + $0xc0] sm:$0xff]  ;;  %vm961_vm8 = vweird.f32 %v2959_v20 }
 0x361   : > { %v1233_v44 = vmul.f32 %v2670_v23, %v1200_v41  ;;  %v804_v3 = vmul.f32 %v754_v11, %v2487_v52  ;;  %v780_v46 = vpop.xlane.xlu2 %779  ;;  %v1183_v50 = vmul.f32 %v944_v29, %v2641_v17  ;;  %v968_v34 = vmul.f32 0.5, %v967_v55 }
 0x362   : > { %v817_v56 = vmul.f32 %v780_v46, %v2487_v52  ;;  %v1098_v5 = vmul.f32 0.5, %v1097_v14  ;;  %v1267_v14 = vld [vmem:[%s2332_s12 + $0xd8] sm:$0xff] }
 0x363   : > { %v1297_v8 = vadd.f32 %v1265_v18, %v1233_v44  ;;  %v2976_v1 = vadd.f32 1e-05, %v804_v3  ;;  %v1756_v13 = vpop.eup %1755  ;;  %v1216_v2 = vmul.f32 %v2670_v23, %v1183_v50  ;;  %v969_v27 = vsub.f32 1.5, %v968_v34 }
 0x364   : > { %v2979_v43 = vadd.f32 1e-05, %v817_v56  ;;  %v1126_v17 = vmul.f32 %v1756_v13, %v2957_v22  ;;  %v2984_v25 = vpop.eup %1757  ;;  %v1099_v39 = vsub.f32 1.5, %v1098_v5  ;;  %vm1132_vm5 = vweird.f32 %v1756_v13 }
 0x365   : > { %1329 = vst [vmem:[%s2695_s7 + $0xc8] sm:$0xff] %v1297_v8  ;;  %1759 = vrsqrt.f32 %v2976_v1  ;;  %v1280_v4 = vadd.f32 %v1248_v54, %v1216_v2  ;;  %v970_v16 = vmul.f32 %v1752_v63, %v969_v27  ;;  %v956_v19 = vmul.f32 %v2984_v25, %v2959_v20  ;;  %vm1133_vm7 = vmor %vm1131_vm3, %vm1132_vm5  ;;  %v1250_v27 = vld [vmem:[%s2332_s12 + $0x50] sm:$0xff] }
 0x366   : > { %1761 = vrsqrt.f32 %v2979_v43  ;;  %v1127_v37 = vmul.f32 %v1756_v13, %v1126_v17  ;;  %v1100_v36 = vmul.f32 %v1754_v31, %v1099_v39  ;;  %vm962_vm6 = vweird.f32 %v2984_v25 }
 0x367   : > { %1312 = vst [vmem:[%s2695_s7 + $0x40] sm:$0xff] %v1280_v4  ;;  %v974_v42 = vsel %vm973_vm1, %v1752_v63, %v970_v16  ;;  %v957_v61 = vmul.f32 %v2984_v25, %v956_v19  ;;  %vm963_vm9 = vmor %vm961_vm8, %vm962_vm6  ;;  %vm991_vm11 = vweird.f32 %v2976_v1  ;;  %vm1121_vm14 = vweird.f32 %v2979_v43 }
 0x368   : > { %v758_v21 = vpop.xlane.xlu1 %757  ;;  %v1128_v7 = vmul.f32 0.5, %v1127_v37  ;;  %v1186_v33 = vmul.f32 %v974_v42, %v2651_v0  ;;  %v1104_v47 = vsel %vm1103_vm4, %v1754_v31, %v1100_v36 }
 0x369   : > { %v806_v26 = vmul.f32 %v758_v21, %v2487_v52  ;;  %v752_v10 = vpop.xlane.xlu2 %751  ;;  %v1199_v57 = vmul.f32 %v1104_v47, %v2654_v28  ;;  %v958_v63 = vmul.f32 0.5, %v957_v61 }
 0x36a   : > { %v803_v32 = vmul.f32 %v752_v10, %v2487_v52  ;;  %v1129_v35 = vsub.f32 1.5, %v1128_v7  ;;  %v1219_v41 = vmul.f32 %v2670_v23, %v1186_v33  ;;  %v1253_v10 = vld [vmem:[%s2332_s12 + $0x68] sm:$0xff] }
 0x36b   : > { %v2997_v62 = vpop.eup %1759  ;;  %v3001_v38 = vadd.f32 1e-05, %v806_v26  ;;  %v1232_v48 = vmul.f32 %v2670_v23, %v1199_v57  ;;  %v959_v18 = vsub.f32 1.5, %v958_v63 }
 0x36c   : > { %v3003_v6 = vpop.eup %1761  ;;  %v986_v0 = vmul.f32 %v2997_v62, %v2976_v1  ;;  %v3010_v31 = vadd.f32 1e-05, %v803_v32  ;;  %v1130_v28 = vmul.f32 %v1756_v13, %v1129_v35  ;;  %v1283_v11 = vadd.f32 %v1251_v9, %v1219_v41  ;;  %v1266_v32 = vld [vmem:[%s2332_s12 + $0xd0] sm:$0xff] }
 0x36d   : > { %v1116_v59 = vmul.f32 %v3003_v6, %v2979_v43  ;;  %1763 = vrsqrt.f32 %v3001_v38  ;;  %v1296_v29 = vadd.f32 %v1264_v51, %v1232_v48  ;;  %v960_v3 = vmul.f32 %v2984_v25, %v959_v18 }
 0x36e   : > { %v987_v44 = vmul.f32 %v2997_v62, %v986_v0  ;;  %v1134_v55 = vsel %vm1133_vm7, %v1756_v13, %v1130_v28  ;;  %1315 = vst [vmem:[%s2695_s7 + $0x58] sm:$0xff] %v1283_v11  ;;  %1765 = vrsqrt.f32 %v3010_v31  ;;  %vm992_vm10 = vweird.f32 %v2997_v62 }
 0x36f   : > { %v1117_v46 = vmul.f32 %v3003_v6, %v1116_v59  ;;  %v1202_v50 = vmul.f32 %v1134_v55, %v2664_v49  ;;  %1328 = vst [vmem:[%s2695_s7 + $0xc0] sm:$0xff] %v1296_v29  ;;  %v964_v56 = vsel %vm963_vm9, %v2984_v25, %v960_v3  ;;  %vm1122_vm12 = vweird.f32 %v3003_v6  ;;  %vm993_vm13 = vmor %vm991_vm11, %vm992_vm10 }
 0x370   : > { %v988_v22 = vmul.f32 0.5, %v987_v44  ;;  %v788_v20 = vpop.xlane.xlu1 %787  ;;  %v1185_v13 = vmul.f32 %v964_v56, %v2667_v60  ;;  %vm1123_vm15 = vmor %vm1121_vm14, %vm1122_vm12  ;;  %vm1011_vm1 = vweird.f32 %v3001_v38  ;;  %vm981_vm4 = vweird.f32 %v3010_v31 }
 0x371   : > { %v1118_v8 = vmul.f32 0.5, %v1117_v46  ;;  %v821_v54 = vmul.f32 %v788_v20, %v2487_v52  ;;  %v784_v34 = vpop.xlane.xlu2 %783  ;;  %v1235_v49 = vmul.f32 %v2670_v23, %v1202_v50  ;;  %v1255_v50 = vld [vmem:[%s2332_s12 + $0x78] sm:$0xff] }
 0x372   : > { %v989_v2 = vsub.f32 1.5, %v988_v22  ;;  %v819_v5 = vmul.f32 %v784_v34, %v2487_v52  ;;  %v1218_v16 = vmul.f32 %v2670_v23, %v1185_v13 }
 0x373   : > { %v1119_v17 = vsub.f32 1.5, %v1118_v8  ;;  %v3039_v25 = vadd.f32 1e-05, %v821_v54  ;;  %v1764_v4 = vpop.eup %1763  ;;  %v1299_v39 = vadd.f32 %v1267_v14, %v1235_v49  ;;  %v1252_v49 = vld [vmem:[%s2332_s12 + $0x60] sm:$0xff] }
 0x374   : > { %v990_v37 = vmul.f32 %v2997_v62, %v989_v2  ;;  %v3043_v19 = vadd.f32 1e-05, %v819_v5  ;;  %v1006_v1 = vmul.f32 %v1764_v4, %v3001_v38  ;;  %v1766_v36 = vpop.eup %1765  ;;  %v1282_v21 = vadd.f32 %v1250_v27, %v1218_v16 }
 0x375   : > { %v1120_v60 = vmul.f32 %v3003_v6, %v1119_v17  ;;  %1767 = vrsqrt.f32 %v3039_v25  ;;  %1331 = vst [vmem:[%s2695_s7 + $0xd8] sm:$0xff] %v1299_v39  ;;  %v976_v26 = vmul.f32 %v1766_v36, %v3010_v31  ;;  %vm1012_vm0 = vweird.f32 %v1764_v4 }
 0x376   : > { %v994_v42 = vsel %vm993_vm13, %v2997_v62, %v990_v37  ;;  %1769 = vrsqrt.f32 %v3043_v19  ;;  %v1007_v43 = vmul.f32 %v1764_v4, %v1006_v1  ;;  %1314 = vst [vmem:[%s2695_s7 + $0x50] sm:$0xff] %v1282_v21  ;;  %vm982_vm2 = vweird.f32 %v1766_v36  ;;  %vm1013_vm3 = vmor %vm1011_vm1, %vm1012_vm0  ;;  %v1270_v37 = vld [vmem:[%s2332_s12 + $0xf0] sm:$0xff] }
 0x377   : > { %v1188_v7 = vmul.f32 %v994_v42, %v2685_v53  ;;  %v1124_v61 = vsel %vm1123_vm15, %v3003_v6, %v1120_v60  ;;  %v977_v9 = vmul.f32 %v1766_v36, %v976_v26  ;;  %vm983_vm5 = vmor %vm981_vm4, %vm982_vm2  ;;  %vm1161_vm7 = vweird.f32 %v3039_v25 }
 0x378   : > { %v1201_v33 = vmul.f32 %v1124_v61, %v2690_v30  ;;  %v1008_v62 = vmul.f32 0.5, %v1007_v43  ;;  %vm1141_vm10 = vweird.f32 %v3043_v19 }
 0x379   : > { %v1221_v47 = vmul.f32 %v2670_v23, %v1188_v7  ;;  %v756_v57 = vpop.xlane.xlu2 %755  ;;  %v978_v51 = vmul.f32 0.5, %v977_v9 }
 0x37a   : > { %v1234_v35 = vmul.f32 %v2670_v23, %v1201_v33  ;;  %v805_v53 = vmul.f32 %v756_v57, %v2487_v52  ;;  %v1009_v41 = vsub.f32 1.5, %v1008_v62 }
 0x37b   : > { %v1768_v63 = vpop.eup %1767  ;;  %v1285_v6 = vadd.f32 %v1253_v10, %v1221_v47  ;;  %v979_v59 = vsub.f32 1.5, %v978_v51  ;;  %v1254_v47 = vld [vmem:[%s2332_s12 + $0x70] sm:$0xff] }
 0x37c   : > { %v1770_v0 = vpop.eup %1769  ;;  %v1298_v48 = vadd.f32 %v1266_v32, %v1234_v35  ;;  %v1156_v30 = vmul.f32 %v1768_v63, %v3039_v25  ;;  %v3068_v28 = vadd.f32 1e-05, %v805_v53  ;;  %v1010_v18 = vmul.f32 %v1764_v4, %v1009_v41 }
 0x37d   : > { %1317 = vst [vmem:[%s2695_s7 + $0x68] sm:$0xff] %v1285_v6  ;;  %v1136_v11 = vmul.f32 %v1770_v0, %v3043_v19  ;;  %v980_v55 = vmul.f32 %v1766_v36, %v979_v59  ;;  %vm1162_vm6 = vweird.f32 %v1768_v63  ;;  %vm1142_vm8 = vweird.f32 %v1770_v0  ;;  %v1268_v19 = vld [vmem:[%s2332_s12 + $0xe0] sm:$0xff]  ;;  %v1271_v6 = vld [vmem:[%s2332_s12 + $0xf8] sm:$0xff] }
 0x37e   : > { %1330 = vst [vmem:[%s2695_s7 + $0xd0] sm:$0xff] %v1298_v48  ;;  %v1157_v44 = vmul.f32 %v1768_v63, %v1156_v30  ;;  %1771 = vrsqrt.f32 %v3068_v28  ;;  %v1014_v29 = vsel %vm1013_vm3, %v1764_v4, %v1010_v18  ;;  %vm1163_vm9 = vmor %vm1161_vm7, %vm1162_vm6  ;;  %vm1001_vm13 = vweird.f32 %v3068_v28 }
 0x37f   : > { %v1137_v38 = vmul.f32 %v1770_v0, %v1136_v11  ;;  %v1190_v3 = vmul.f32 %v1014_v29, %v2706_v24  ;;  %v984_v22 = vsel %vm983_vm5, %v1766_v36, %v980_v55  ;;  %vm1143_vm11 = vmor %vm1141_vm10, %vm1142_vm8 }
 0x380   : > { %v1158_v46 = vmul.f32 0.5, %v1157_v44  ;;  %v1187_v8 = vmul.f32 %v984_v22, %v2709_v45 }
 0x381   : > { %v1138_v20 = vmul.f32 0.5, %v1137_v38  ;;  %v790_v14 = vpop.xlane.xlu2 %789  ;;  %v1223_v56 = vmul.f32 %v2670_v23, %v1190_v3 }
 0x382   : > { %v1159_v54 = vsub.f32 1.5, %v1158_v46  ;;  %v822_v34 = vmul.f32 %v790_v14, %v2487_v52  ;;  %v1220_v2 = vmul.f32 %v2670_v23, %v1187_v8 }
 0x383   : > { %v1139_v31 = vsub.f32 1.5, %v1138_v20  ;;  %v1287_v13 = vadd.f32 %v1255_v50, %v1223_v56 }
 0x384   : > { %v1772_v24 = vpop.eup %1771  ;;  %v1160_v5 = vmul.f32 %v1768_v63, %v1159_v54  ;;  %v854_v27 = vadd.f32 1e-05, %v822_v34  ;;  %v1284_v17 = vadd.f32 %v1252_v49, %v1220_v2 }
 0x385   : > { %v1140_v45 = vmul.f32 %v1770_v0, %v1139_v31  ;;  %v996_v52 = vmul.f32 %v1772_v24, %v3068_v28  ;;  %1319 = vst [vmem:[%s2695_s7 + $0x78] sm:$0xff] %v1287_v13  ;;  %vm1002_vm12 = vweird.f32 %v1772_v24 }
 0x386   : > { %v1164_v25 = vsel %vm1163_vm9, %v1768_v63, %v1160_v5  ;;  %1773 = vrsqrt.f32 %v854_v27  ;;  %1316 = vst [vmem:[%s2695_s7 + $0x60] sm:$0xff] %v1284_v17  ;;  %vm1003_vm14 = vmor %vm1001_vm13, %vm1002_vm12  ;;  %vm1171_vm0 = vweird.f32 %v854_v27 }
 0x387   : > { %v1205_v4 = vmul.f32 %v1164_v25, %v2719_v58  ;;  %v1144_v39 = vsel %vm1143_vm11, %v1770_v0, %v1140_v45  ;;  %v997_v16 = vmul.f32 %v1772_v24, %v996_v52 }
 0x388   : > { %v1203_v60 = vmul.f32 %v1144_v39, %v2722_v12 }
 0x389   : > { %v1238_v1 = vmul.f32 %v2670_v23, %v1205_v4  ;;  %v998_v36 = vmul.f32 0.5, %v997_v16 }
 0x38a   : > { %v1236_v21 = vmul.f32 %v2670_v23, %v1203_v60 }
 0x38b   : > { %v1302_v42 = vadd.f32 %v1270_v37, %v1238_v1  ;;  %v999_v7 = vsub.f32 1.5, %v998_v36 }
 0x38c   : > { %v1774_v61 = vpop.eup %1773  ;;  %v1300_v43 = vadd.f32 %v1268_v19, %v1236_v21 }
 0x38d   : > { %1334 = vst [vmem:[%s2695_s7 + $0xf0] sm:$0xff] %v1302_v42  ;;  %v1000_v58 = vmul.f32 %v1772_v24, %v999_v7  ;;  %v1166_v26 = vmul.f32 %v1774_v61, %v854_v27  ;;  %vm1172_vm15 = vweird.f32 %v1774_v61 }
 0x38e   : > { %1332 = vst [vmem:[%s2695_s7 + $0xe0] sm:$0xff] %v1300_v43  ;;  %vm1173_vm1 = vmor %vm1171_vm0, %vm1172_vm15 }
 0x38f   : > { %v1004_v12 = vsel %vm1003_vm14, %v1772_v24, %v1000_v58  ;;  %v1167_v10 = vmul.f32 %v1774_v61, %v1166_v26 }
 0x390   : > { %v1189_v33 = vmul.f32 %v1004_v12, %v2730_v15 }
 0x391   : > { %v1168_v32 = vmul.f32 0.5, %v1167_v10 }
 0x392   : > { %v1222_v62 = vmul.f32 %v2670_v23, %v1189_v33 }
 0x393   : > { %v1169_v9 = vsub.f32 1.5, %v1168_v32 }
 0x394   : > { %v1286_v57 = vadd.f32 %v1254_v47, %v1222_v62 }
 0x395   : > { %v1170_v35 = vmul.f32 %v1774_v61, %v1169_v9 }
 0x396   : > { %1318 = vst [vmem:[%s2695_s7 + $0x70] sm:$0xff] %v1286_v57 }
 0x397   : > { %v1174_v53 = vsel %vm1173_vm1, %v1774_v61, %v1170_v35 }
 0x398   : > { %v1206_v63 = vmul.f32 %v1174_v53, %v2736_v40 }
 0x39a   : > { %v1239_v41 = vmul.f32 %v2670_v23, %v1206_v63  ;;  %1343 = sbr.rel (!%p2218_p7) target bundleno = 958 (0x3be), region = 56 }
 0x39c   : > { %v1303_v15 = vadd.f32 %v1271_v6, %v1239_v41 }
 0x39e   : > { %1335 = vst [vmem:[%s2695_s7 + $0xf8] sm:$0xff] %v1303_v15 }
 0x39f   : > { %s3262_s18 = smov (!%p1346_p6, %s1345_s18), 32 }
 0x3a0   : > { %s1554_s25 = sshll.u32 %s3262_s18, 3 }
 0x3a1   : > { %s1349_s20 = ssub.s32 256, %s1554_s25 }
 0x3a2   : > { %s1350_s21 = sshll.u32 %s1349_s20, 4 }
 0x3a3   : > { %1351 = vsyncadd %s1337_s9, %s1350_s21  ;;  %s3232_s22 = sld [smem:[#allocation17_spill]]  ;;  %p3114_p13 = scmp.ne.s32.totalorder %s1554_s25, 0 }
 0x3a4   : > { %s1358_s14 = sshll.u32 %s2695_s7, 4  ;;  %s1558_s11 = sshll.u32 %s3262_s18, 7  ;;  %s3121_s14 = int_to_ptr.vmem [resolvable:$true] %s1358_s14 }
 0x3a5   : > { %s3234_s26 = sld [smem:[#allocation28_spill]]  ;;  %s1913_s27 = sshra.s32 %s3121_s14, 4  ;;  %s1914_s27 = int_to_ptr.vmem [resolvable:$true] %s1913_s27 }
 0x3a6   : > { %s1915_s10 = sshrl.u32 %s1558_s11, 4  ;;  %s2067_s28 = smov [#allocation10]  }
 0x3a7   : > { %s1920_s12 = scalar_lea.vmem %s1914_s27, %s1915_s10  ;;  %s1924_s7 = scalar_lea.vmem %s2067_s28, 512 }
 0x3a8   : > { %p1921_p7 = scmp.ne.s32.totalorder %s1914_s27, %s1920_s12  ;;  %p1926_p2 = scmp.lt.s32.totalorder %s1924_s7, %s1920_s12 }
 0x3a9   : > { %s1581_s23 = smul.u32 36, %s3232_s22 }
 0x3aa   : > { %p1922_p11 = pnand %p1921_p7, %p3114_p13 }
 0x3ab   : > { %s1354_s1 = sadd.s32 %s1581_s23, %s1553_s5 }
 0x3ac   : > { %s1556_s13 = sshll.u32 %s1354_s1, 3  ;;  %p1923_p12 = pneg %p1922_p11 }
 0x3ad   : > { %s1356_s2 = scalar_lea.hbm %s3234_s26, %s1556_s13 }
 0x3ae   : > { %s1360_s30 = sshll.u32 %s1356_s2, 4  ;;  %p1928_p8 = pnand %p1926_p2, %p1923_p12  ;;  %s3126_s30 = int_to_ptr.hbm [resolvable:$true] %s1360_s30 }
 0x3b0   : > { %1931 = shalt.err (!%p1928_p8)
}
 0x3b1   : > { %s1932_s29 = sshra.s32 %s3126_s30, 4  ;;  %s1943_s21 = scalar_lea.hbm %s3234_s26, 576  ;;  %s1933_s29 = int_to_ptr.hbm [resolvable:$true] %s1932_s29 }
 0x3b2   : > { %s1939_s5 = scalar_lea.hbm %s1933_s29, %s1915_s10  ;;  %p1944_p0 = scmp.lt.s32.totalorder %s1933_s29, %s3234_s26 }
 0x3b3   : > { %p1940_p1 = scmp.ne.s32.totalorder %s1933_s29, %s1939_s5  ;;  %p1945_p3 = scmp.lt.s32.totalorder %s1943_s21, %s1939_s5 }
 0x3b5   : > { %p1941_p9 = pnand %p1940_p1, %p3114_p13  ;;  %p1946_p4 = por %p1945_p3, %p1944_p0 }
 0x3b7   : > { %p1942_p5 = pneg %p1941_p9 }
 0x3b9   : > { %p1947_p6 = pnand %p1946_p4, %p1942_p5 }
 0x3bb   : > { %1950 = shalt.err (!%p1947_p6)
}
 0x3bc   : > { %s2068_s1 = smov 128   ;;  %s2069_s13 = smov 8  }
 0x3bd   : > { %1366 = dma.vmem_to_hbm [thread:$0]  (%p3114_p13), %s3121_s14, %s1558_s11, %s3126_s30, %s1337_s9, %s2068_s1, %s2068_s1, %s2069_s13  }
 0x3be PF: > { %s3235_s6 = sld [smem:[#allocation20_spill]] }
 0x3bf   : > { %s3236_s4 = sld [smem:[#allocation15_spill]] }
 0x3c4   : > { %p1608_p7 = scmp.ge.s32.totalorder %s3235_s6, 2 }
 0x3c5   : > { %s1375_s27 = sand.u32 1, %s3236_s4  }
 0x3c6   : > { %p1601_p11 = pnand %p1608_p7, %p2226_p10  ;;  %s1376_s10 = scalar_lea.sflag [#allocation4], %s1375_s27 }
 0x3c8   : > { %p1602_p12 = pneg %p1601_p11 }
 0x3ca   : > { %2009 = dma.done.wait (%p1602_p12), %s1376_s10, 4096  }
 0x3cb   : > { %2011 = vsyncadd (%p1602_p12), %s1376_s10, 4294963200  ;;  %s24_s25 = sadd.s32 1, %s3235_s6   ;;  %s3238_s8 = sld [smem:[#allocation23_spill]] }
 0x3cc   : > { %p21_p2 = scmp.ge.s32.totalorder %s24_s25, 6   ;;  %s3239_s9 = sld [smem:[#allocation16_spill]] }
 0x3cd   : > { %s3240_s20 = sld [smem:[#allocation24_spill]]  ;;  %s3244_s15 = smov %s2018_s16 }
 0x3ce   : > { %s3241_s21 = sld [smem:[#allocation19_spill]]  ;;  %s3245_s16 = smov %s2022_s17 }
 0x3cf   : > { %s3242_s23 = sld [smem:[#allocation21_spill]]  ;;  %s3247_s18 = smov %s2030_s19 }
 0x3d0   : > { %s3243_s14 = sld [smem:[#allocation22_spill]]  ;;  %s3249_s22 = smov %s2050_s24 }
 0x3d1   : > { %s3246_s17 = smov %s3238_s8 }
 0x3d2   : > { %s3248_s19 = smov %s3239_s9  ;;  %23 = sbr.rel (!%p21_p2) target bundleno = 16 (0x10), region = 102 }
 0x3d6   : > { %s3250_s24 = smov %s3243_s14 }
 0x3d7   :  { %1382 = vsyncpa [#allocation3], 1 }
 0x3d8   :  { %1384 = vsyncpa [#allocation3 + $0x1], 1 }
 0x3d9   :  { %1385 = vsyncpa [#allocation6], 1 }
 0x3da   :  { %1386 = vsyncpa [#allocation9], 1 }
 0x3db   :  { %1388 = vsyncpa [#allocation9 + $0x1], 1 }
 0x3dc   :  { %1389 = vsyncpa [#allocation4], 1 }
 0x3dd   :  { %1391 = vsyncpa [#allocation4 + $0x1], 1 }

</bundles_post_ra>
